<compile_context>
chip_gen: v7x
topology: tpu7x:2x2x1
jax: 0.10.0
libtpu: 0.0.40
codegen_flags: <defaults>
</compile_context>

<pallas_src>
import jax
import jax.numpy as jnp
from jax import lax
from jax.experimental import pallas as pl
from jax.experimental.pallas import tpu as pltpu
import numpy as np

BN_EPS = 1e-5
_VMEM_LIMIT = 32 * 1024 * 1024        # scoped-VMEM ceiling we compile against
_VMEM_TILE_BUDGET = 18 * 1024 * 1024  # per-tile budget (incl. double buffering)

# Output-parity tap tables for ConvTranspose2d(kernel=4, stride=2, padding=1):
#   out[2*q + r] = sum_{(k, off) in _TAPS[r]} x_pad[q + off] * W[..., k]
# where x_pad has one row/col of zeros on each side (off indexes that padded axis).
_TAPS = (
    ((1, 1), (3, 0)),   # parity 0: (kernel index, padded offset)
    ((0, 2), (2, 1)),   # parity 1
)


def _phase_accs(xm_ref, xh0_ref, xh1_ref, w4_ref):
    """Yields (phase_index, acc) with acc = (th*W, Cout) f32 conv result of
    output-parity phase (rh, rw) for the current (batch, row-tile) block."""
    xm = xm_ref[0]                                                # (th, W+2, Cin) bf16
    xf = jnp.concatenate([xm, xh0_ref[0], xh1_ref[0]], axis=0)    # (th+2, W+2, Cin)
    th, wp2, cin = xm.shape
    w = wp2 - 2
    for rh in range(2):
        for rw in range(2):
            parts = [xf[r0:r0 + th, c0:c0 + w, :]
                     for (_, r0) in _TAPS[rh]
                     for (_, c0) in _TAPS[rw]]
            patch = jnp.concatenate(parts, axis=-1)               # (th, W, 4*Cin)
            patch = patch.reshape(th * w, 4 * cin)                # taps folded into K
            acc = jnp.dot(patch, w4_ref[rh, rw],
                          preferred_element_type=jnp.float32)     # (th*W, Cout) f32
            yield 2 * rh + rw, acc


def _stats_kernel(xm_ref, xh0_ref, xh1_ref, w4_ref, stat_ref):
    """Pass 1: conv + per-channel sum / sum-of-squares (one-pass BN stats)."""
    cout = stat_ref.shape[-1]
    s = jnp.zeros((1, cout), jnp.float32)
    ss = jnp.zeros((1, cout), jnp.float32)
    for _, acc in _phase_accs(xm_ref, xh0_ref, xh1_ref, w4_ref):
        s = s + jnp.sum(acc, axis=0, keepdims=True)
        ss = ss + jnp.sum(acc * acc, axis=0, keepdims=True)
    stat_ref[0, 0] = jnp.concatenate([s, ss], axis=0)             # (2, Cout)


def _apply_kernel(xm_ref, xh0_ref, xh1_ref, w4_ref, a_ref, b_ref, out_ref):
    """Pass 2: conv (recomputed) + BN affine + ReLU, phase-major output layout."""
    th = xm_ref.shape[1]
    w = xm_ref.shape[2] - 2
    cout = out_ref.shape[-1]
    a = a_ref[...]                                                # (1, Cout) f32
    b = b_ref[...]
    for p, acc in _phase_accs(xm_ref, xh0_ref, xh1_ref, w4_ref):
        y = jnp.maximum(acc * a + b, 0.0)
        out_ref[0, p] = y.reshape(th, w, cout).astype(out_ref.dtype)


def _pick_row_tile(H, W, Cin, Cout):
    """Largest divisor of H (<=64) whose double-buffered tile fits the budget."""
    def tile_bytes(th):
        in_b = (th + 2) * (W + 2) * Cin * 2       # bf16 input rows incl. halo
        out_b = 4 * th * W * Cout * 4             # f32 output tile (4 phases)
        scratch = 4 * th * W * Cin * 2            # one phase's im2col patch
        return 2 * (in_b + out_b) + scratch
    for th in range(min(H, 64), 0, -1):
        if H % th == 0 and tile_bytes(th) <= _VMEM_TILE_BUDGET:
            return th
    return 1


def unet_up_forward(x_nchw, skip_nchw, w_t, gamma, beta):
    """UNetUp.forward: ConvT(4,2,1, no bias) -> BN(train stats) -> ReLU -> cat(skip).

    x_nchw:    (N, Cin, H, W)
    skip_nchw: (N, Cskip, 2H, 2W)
    w_t:       (Cin, Cout, 4, 4)    PyTorch ConvTranspose2d weight layout
    gamma/beta:(Cout,)              BatchNorm2d affine params
    returns    (N, Cout + Cskip, 2H, 2W)
    """
    N, Cin, H, W = x_nchw.shape
    Cout = w_t.shape[1]
    OH, OW = 2 * H, 2 * W

    # ---- layout glue (outside the kernels) ---------------------------------
    # NCHW -> NHWC, bf16 for the MXU, +1 row/col of zero halo on each side.
    # TODO(synk): if the surrounding model can consume NHWC these transposes vanish.
    x = jnp.transpose(x_nchw, (0, 2, 3, 1)).astype(jnp.bfloat16)
    xp = jnp.pad(x, ((0, 0), (1, 1), (1, 1), (0, 0)))             # (N, H+2, W+2, Cin)

    # Pack, per output-parity phase, its 4 taps along the matmul K dimension.
    w_k = jnp.transpose(w_t, (2, 3, 0, 1)).astype(jnp.bfloat16)   # (4, 4, Cin, Cout)
    w4 = jnp.stack([
        jnp.stack([
            jnp.concatenate([w_k[kh, kw]
                             for (kh, _) in _TAPS[rh]
                             for (kw, _) in _TAPS[rw]], axis=0)
            for rw in range(2)], axis=0)
        for rh in range(2)], axis=0)                              # (2, 2, 4*Cin, Cout)

    th = _pick_row_tile(H, W, Cin, Cout)
    T = H // th
    grid = (N, T)

    x_main = pl.BlockSpec((1, th, W + 2, Cin), lambda n, t: (n, t, 0, 0))
    x_halo0 = pl.BlockSpec((1, 1, W + 2, Cin), lambda n, t: (n, (t + 1) * th, 0, 0))
    x_halo1 = pl.BlockSpec((1, 1, W + 2, Cin), lambda n, t: (n, (t + 1) * th + 1, 0, 0))
    w_spec = pl.BlockSpec((2, 2, 4 * Cin, Cout), lambda n, t: (0, 0, 0, 0))
    cparams = pltpu.CompilerParams(
        dimension_semantics=("parallel", "parallel"),
        vmem_limit_bytes=_VMEM_LIMIT)

    # ---- pass 1: per-tile partial BN statistics -----------------------------
    stats = pl.pallas_call(
        _stats_kernel,
        out_shape=jax.ShapeDtypeStruct((N, T, 2, Cout), jnp.float32),
        grid=grid,
        in_specs=[x_main, x_halo0, x_halo1, w_spec],
        out_specs=pl.BlockSpec((1, 1, 2, Cout), lambda n, t: (n, t, 0, 0)),
        compiler_params=cparams,
    )(xp, xp, xp, w4)

    tot = jnp.sum(stats, axis=(0, 1))                             # (2, Cout), tiny
    cnt = float(N * OH * OW)
    mean = tot[0] / cnt
    var = jnp.maximum(tot[1] / cnt - mean * mean, 0.0)            # one-pass stats
    scale = gamma.astype(jnp.float32) * lax.rsqrt(var + BN_EPS)
    shift = beta.astype(jnp.float32) - mean * scale

    # ---- pass 2: conv + BN affine + ReLU, phase-major output ----------------
    y5 = pl.pallas_call(
        _apply_kernel,
        out_shape=jax.ShapeDtypeStruct((N, 4, H, W, Cout), jnp.float32),
        grid=grid,
        in_specs=[x_main, x_halo0, x_halo1, w_spec,
                  pl.BlockSpec((1, Cout), lambda n, t: (0, 0)),
                  pl.BlockSpec((1, Cout), lambda n, t: (0, 0))],
        out_specs=pl.BlockSpec((1, 4, th, W, Cout), lambda n, t: (n, 0, t, 0, 0)),
        compiler_params=cparams,
    )(xp, xp, xp, w4, scale.reshape(1, Cout), shift.reshape(1, Cout))

    # De-interleave the 4 parity phases straight into NCHW, then concat skip
    # (skip never touched the kernel and needs no transpose).
    y6 = y5.reshape(N, 2, 2, H, W, Cout)
    y_nchw = jnp.transpose(y6, (0, 5, 3, 1, 4, 2)).reshape(N, Cout, OH, OW)
    return jnp.concatenate([y_nchw, skip_nchw.astype(y_nchw.dtype)], axis=1)


def unet_up_reference(x_nchw, skip_nchw, w_t, gamma, beta):
    """Pure-JAX f32 reference for validation."""
    x = jnp.transpose(x_nchw, (0, 2, 3, 1))
    wc = jnp.transpose(w_t, (2, 3, 0, 1))[::-1, ::-1]
    y = lax.conv_general_dilated(
        x, wc, window_strides=(1, 1), padding=[(2, 2), (2, 2)],
        lhs_dilation=(2, 2), dimension_numbers=("NHWC", "HWIO", "NHWC"))
    mean = jnp.mean(y, axis=(0, 1, 2), keepdims=True)
    var = jnp.mean((y - mean) ** 2, axis=(0, 1, 2), keepdims=True)
    y = (y - mean) * lax.rsqrt(var + BN_EPS) * gamma.reshape(1, 1, 1, -1) \
        + beta.reshape(1, 1, 1, -1)
    y = jnp.maximum(y, 0.0)
    out = jnp.concatenate([y, jnp.transpose(skip_nchw, (0, 2, 3, 1))], axis=-1)
    return jnp.transpose(out, (0, 3, 1, 2))


if __name__ == "__main__":
    # small shapes: N=2, in_size=8, out_size=16, H=W=8 (skip is 2x spatial, out_size ch)
    N, Cin, Cout, H, W = 2, 8, 16, 8, 8
    key = jax.random.PRNGKey(0)
    kx, ks, kw, kg, kb = jax.random.split(key, 5)

    x = jax.random.normal(kx, (N, Cin, H, W), jnp.float32)
    skip = jax.random.normal(ks, (N, Cout, 2 * H, 2 * W), jnp.float32)
    w_t = jax.random.normal(kw, (Cin, Cout, 4, 4), jnp.float32) * 0.1
    gamma = 1.0 + 0.1 * jax.random.normal(kg, (Cout,), jnp.float32)
    beta = 0.1 * jax.random.normal(kb, (Cout,), jnp.float32)

    out = jax.block_until_ready(jax.jit(unet_up_forward)(x, skip, w_t, gamma, beta))
    ref = jax.block_until_ready(unet_up_reference(x, skip, w_t, gamma, beta))

    assert out.shape == (N, 2 * Cout, 2 * H, 2 * W), out.shape
    # bf16 MXU operands vs. the f32 reference -> looser tolerance than pure f32.
    np.testing.assert_allclose(np.asarray(out), np.asarray(ref), rtol=5e-2, atol=5e-2)
    print("KERNEL_OK")
</pallas_src>

<mosaic_0001>
module attributes {stable_mosaic.version = 11 : i64} {
  func.func @_stats_kernel(%arg0: i32, %arg1: i32, %arg2: memref<1x8x10x8xbf16, #tpu.memory_space<vmem>>, %arg3: memref<1x1x10x8xbf16, #tpu.memory_space<vmem>>, %arg4: memref<1x1x10x8xbf16, #tpu.memory_space<vmem>>, %arg5: memref<2x2x32x16xbf16, #tpu.memory_space<vmem>>, %arg6: memref<1x1x2x16xf32, #tpu.memory_space<vmem>>) attributes {dimension_semantics = [#tpu.dimension_semantics<parallel>, #tpu.dimension_semantics<parallel>], iteration_bounds = array<i64: 2, 1>, scalar_prefetch = 0 : i64, scratch_operands = 0 : i64, tpu.core_type = #tpu.core_type<tc>, window_params = [{transform_indices = @transform_0, window_bounds = array<i64: 1, 8, 10, 8>}, {transform_indices = @transform_1, window_bounds = array<i64: 1, 1, 10, 8>}, {transform_indices = @transform_2, window_bounds = array<i64: 1, 1, 10, 8>}, {pipeline_mode = #tpu.pipeline_mode<synchronous>, transform_indices = @transform_3, window_bounds = array<i64: 2, 2, 32, 16>}, {transform_indices = @transform_4, window_bounds = array<i64: 1, 1, 2, 16>}]} {
    %cst = arith.constant 0.000000e+00 : f32
    %0 = vector.broadcast %cst : f32 to vector<1x16xf32>
    %cst_0 = arith.constant 0.000000e+00 : f32
    %1 = vector.broadcast %cst_0 : f32 to vector<1x16xf32>
    %c0 = arith.constant 0 : index
    %c0_1 = arith.constant 0 : index
    %c0_2 = arith.constant 0 : index
    %c0_3 = arith.constant 0 : index
    %2 = vector.load %arg2[%c0, %c0_1, %c0_2, %c0_3] : memref<1x8x10x8xbf16, #tpu.memory_space<vmem>>, vector<1x8x10x8xbf16>
    %3 = vector.shape_cast %2 : vector<1x8x10x8xbf16> to vector<8x10x8xbf16>
    %c0_4 = arith.constant 0 : index
    %c0_5 = arith.constant 0 : index
    %c0_6 = arith.constant 0 : index
    %c0_7 = arith.constant 0 : index
    %4 = vector.load %arg3[%c0_4, %c0_5, %c0_6, %c0_7] : memref<1x1x10x8xbf16, #tpu.memory_space<vmem>>, vector<1x1x10x8xbf16>
    %5 = vector.shape_cast %4 : vector<1x1x10x8xbf16> to vector<1x10x8xbf16>
    %c0_8 = arith.constant 0 : index
    %c0_9 = arith.constant 0 : index
    %c0_10 = arith.constant 0 : index
    %c0_11 = arith.constant 0 : index
    %6 = vector.load %arg4[%c0_8, %c0_9, %c0_10, %c0_11] : memref<1x1x10x8xbf16, #tpu.memory_space<vmem>>, vector<1x1x10x8xbf16>
    %7 = vector.shape_cast %6 : vector<1x1x10x8xbf16> to vector<1x10x8xbf16>
    %8 = tpu.concatenate %3, %5, %7 in 0 : vector<8x10x8xbf16>, vector<1x10x8xbf16>, vector<1x10x8xbf16> -> vector<10x10x8xbf16>
    %9 = vector.extract_strided_slice %8 {offsets = [1, 1, 0], sizes = [8, 8, 8], strides = [1, 1, 1]} : vector<10x10x8xbf16> to vector<8x8x8xbf16>
    %10 = vector.extract_strided_slice %8 {offsets = [1, 0, 0], sizes = [8, 8, 8], strides = [1, 1, 1]} : vector<10x10x8xbf16> to vector<8x8x8xbf16>
    %11 = vector.extract_strided_slice %8 {offsets = [0, 1, 0], sizes = [8, 8, 8], strides = [1, 1, 1]} : vector<10x10x8xbf16> to vector<8x8x8xbf16>
    %12 = vector.extract_strided_slice %8 {offsets = [0, 0, 0], sizes = [8, 8, 8], strides = [1, 1, 1]} : vector<10x10x8xbf16> to vector<8x8x8xbf16>
    %13 = tpu.concatenate %9, %10, %11, %12 in 2 : vector<8x8x8xbf16>, vector<8x8x8xbf16>, vector<8x8x8xbf16>, vector<8x8x8xbf16> -> vector<8x8x32xbf16>
    %14 = vector.shape_cast %13 : vector<8x8x32xbf16> to vector<64x32xbf16>
    %c0_12 = arith.constant 0 : index
    %c0_13 = arith.constant 0 : index
    %c0_14 = arith.constant 0 : index
    %c0_15 = arith.constant 0 : index
    %15 = vector.load %arg5[%c0_12, %c0_13, %c0_14, %c0_15] : memref<2x2x32x16xbf16, #tpu.memory_space<vmem>>, vector<1x1x32x16xbf16>
    %16 = vector.shape_cast %15 : vector<1x1x32x16xbf16> to vector<32x16xbf16>
    %cst_16 = arith.constant dense<0.000000e+00> : vector<64x16xf32>
    %17 = tpu.matmul %14, %16, %cst_16 {dimension_numbers = #tpu.dot_dimension_numbers<[1], [0], [0], [1], [0, 0, 1, 1], [], []>} : vector<64x32xbf16>, vector<32x16xbf16>, vector<64x16xf32> -> vector<64x16xf32>
    %cst_17 = arith.constant dense<0.000000e+00> : vector<16xf32>
    %18 = vector.multi_reduction <add>, %17, %cst_17 [0] : vector<64x16xf32> to vector<16xf32>
    %19 = vector.shape_cast %18 : vector<16xf32> to vector<1x16xf32>
    %20 = arith.addf %0, %19 : vector<1x16xf32>
    %21 = arith.mulf %17, %17 : vector<64x16xf32>
    %cst_18 = arith.constant dense<0.000000e+00> : vector<16xf32>
    %22 = vector.multi_reduction <add>, %21, %cst_18 [0] : vector<64x16xf32> to vector<16xf32>
    %23 = vector.shape_cast %22 : vector<16xf32> to vector<1x16xf32>
    %24 = arith.addf %1, %23 : vector<1x16xf32>
    %25 = vector.extract_strided_slice %8 {offsets = [1, 2, 0], sizes = [8, 8, 8], strides = [1, 1, 1]} : vector<10x10x8xbf16> to vector<8x8x8xbf16>
    %26 = vector.extract_strided_slice %8 {offsets = [1, 1, 0], sizes = [8, 8, 8], strides = [1, 1, 1]} : vector<10x10x8xbf16> to vector<8x8x8xbf16>
    %27 = vector.extract_strided_slice %8 {offsets = [0, 2, 0], sizes = [8, 8, 8], strides = [1, 1, 1]} : vector<10x10x8xbf16> to vector<8x8x8xbf16>
    %28 = vector.extract_strided_slice %8 {offsets = [0, 1, 0], sizes = [8, 8, 8], strides = [1, 1, 1]} : vector<10x10x8xbf16> to vector<8x8x8xbf16>
    %29 = tpu.concatenate %25, %26, %27, %28 in 2 : vector<8x8x8xbf16>, vector<8x8x8xbf16>, vector<8x8x8xbf16>, vector<8x8x8xbf16> -> vector<8x8x32xbf16>
    %30 = vector.shape_cast %29 : vector<8x8x32xbf16> to vector<64x32xbf16>
    %c0_19 = arith.constant 0 : index
    %c1 = arith.constant 1 : index
    %c0_20 = arith.constant 0 : index
    %c0_21 = arith.constant 0 : index
    %31 = vector.load %arg5[%c0_19, %c1, %c0_20, %c0_21] : memref<2x2x32x16xbf16, #tpu.memory_space<vmem>>, vector<1x1x32x16xbf16>
    %32 = vector.shape_cast %31 : vector<1x1x32x16xbf16> to vector<32x16xbf16>
    %cst_22 = arith.constant dense<0.000000e+00> : vector<64x16xf32>
    %33 = tpu.matmul %30, %32, %cst_22 {dimension_numbers = #tpu.dot_dimension_numbers<[1], [0], [0], [1], [0, 0, 1, 1], [], []>} : vector<64x32xbf16>, vector<32x16xbf16>, vector<64x16xf32> -> vector<64x16xf32>
    %cst_23 = arith.constant dense<0.000000e+00> : vector<16xf32>
    %34 = vector.multi_reduction <add>, %33, %cst_23 [0] : vector<64x16xf32> to vector<16xf32>
    %35 = vector.shape_cast %34 : vector<16xf32> to vector<1x16xf32>
    %36 = arith.addf %20, %35 : vector<1x16xf32>
    %37 = arith.mulf %33, %33 : vector<64x16xf32>
    %cst_24 = arith.constant dense<0.000000e+00> : vector<16xf32>
    %38 = vector.multi_reduction <add>, %37, %cst_24 [0] : vector<64x16xf32> to vector<16xf32>
    %39 = vector.shape_cast %38 : vector<16xf32> to vector<1x16xf32>
    %40 = arith.addf %24, %39 : vector<1x16xf32>
    %41 = vector.extract_strided_slice %8 {offsets = [2, 1, 0], sizes = [8, 8, 8], strides = [1, 1, 1]} : vector<10x10x8xbf16> to vector<8x8x8xbf16>
    %42 = vector.extract_strided_slice %8 {offsets = [2, 0, 0], sizes = [8, 8, 8], strides = [1, 1, 1]} : vector<10x10x8xbf16> to vector<8x8x8xbf16>
    %43 = vector.extract_strided_slice %8 {offsets = [1, 1, 0], sizes = [8, 8, 8], strides = [1, 1, 1]} : vector<10x10x8xbf16> to vector<8x8x8xbf16>
    %44 = vector.extract_strided_slice %8 {offsets = [1, 0, 0], sizes = [8, 8, 8], strides = [1, 1, 1]} : vector<10x10x8xbf16> to vector<8x8x8xbf16>
    %45 = tpu.concatenate %41, %42, %43, %44 in 2 : vector<8x8x8xbf16>, vector<8x8x8xbf16>, vector<8x8x8xbf16>, vector<8x8x8xbf16> -> vector<8x8x32xbf16>
    %46 = vector.shape_cast %45 : vector<8x8x32xbf16> to vector<64x32xbf16>
    %c1_25 = arith.constant 1 : index
    %c0_26 = arith.constant 0 : index
    %c0_27 = arith.constant 0 : index
    %c0_28 = arith.constant 0 : index
    %47 = vector.load %arg5[%c1_25, %c0_26, %c0_27, %c0_28] : memref<2x2x32x16xbf16, #tpu.memory_space<vmem>>, vector<1x1x32x16xbf16>
    %48 = vector.shape_cast %47 : vector<1x1x32x16xbf16> to vector<32x16xbf16>
    %cst_29 = arith.constant dense<0.000000e+00> : vector<64x16xf32>
    %49 = tpu.matmul %46, %48, %cst_29 {dimension_numbers = #tpu.dot_dimension_numbers<[1], [0], [0], [1], [0, 0, 1, 1], [], []>} : vector<64x32xbf16>, vector<32x16xbf16>, vector<64x16xf32> -> vector<64x16xf32>
    %cst_30 = arith.constant dense<0.000000e+00> : vector<16xf32>
    %50 = vector.multi_reduction <add>, %49, %cst_30 [0] : vector<64x16xf32> to vector<16xf32>
    %51 = vector.shape_cast %50 : vector<16xf32> to vector<1x16xf32>
    %52 = arith.addf %36, %51 : vector<1x16xf32>
    %53 = arith.mulf %49, %49 : vector<64x16xf32>
    %cst_31 = arith.constant dense<0.000000e+00> : vector<16xf32>
    %54 = vector.multi_reduction <add>, %53, %cst_31 [0] : vector<64x16xf32> to vector<16xf32>
    %55 = vector.shape_cast %54 : vector<16xf32> to vector<1x16xf32>
    %56 = arith.addf %40, %55 : vector<1x16xf32>
    %57 = vector.extract_strided_slice %8 {offsets = [2, 2, 0], sizes = [8, 8, 8], strides = [1, 1, 1]} : vector<10x10x8xbf16> to vector<8x8x8xbf16>
    %58 = vector.extract_strided_slice %8 {offsets = [2, 1, 0], sizes = [8, 8, 8], strides = [1, 1, 1]} : vector<10x10x8xbf16> to vector<8x8x8xbf16>
    %59 = vector.extract_strided_slice %8 {offsets = [1, 2, 0], sizes = [8, 8, 8], strides = [1, 1, 1]} : vector<10x10x8xbf16> to vector<8x8x8xbf16>
    %60 = vector.extract_strided_slice %8 {offsets = [1, 1, 0], sizes = [8, 8, 8], strides = [1, 1, 1]} : vector<10x10x8xbf16> to vector<8x8x8xbf16>
    %61 = tpu.concatenate %57, %58, %59, %60 in 2 : vector<8x8x8xbf16>, vector<8x8x8xbf16>, vector<8x8x8xbf16>, vector<8x8x8xbf16> -> vector<8x8x32xbf16>
    %62 = vector.shape_cast %61 : vector<8x8x32xbf16> to vector<64x32xbf16>
    %c1_32 = arith.constant 1 : index
    %c1_33 = arith.constant 1 : index
    %c0_34 = arith.constant 0 : index
    %c0_35 = arith.constant 0 : index
    %63 = vector.load %arg5[%c1_32, %c1_33, %c0_34, %c0_35] : memref<2x2x32x16xbf16, #tpu.memory_space<vmem>>, vector<1x1x32x16xbf16>
    %64 = vector.shape_cast %63 : vector<1x1x32x16xbf16> to vector<32x16xbf16>
    %cst_36 = arith.constant dense<0.000000e+00> : vector<64x16xf32>
    %65 = tpu.matmul %62, %64, %cst_36 {dimension_numbers = #tpu.dot_dimension_numbers<[1], [0], [0], [1], [0, 0, 1, 1], [], []>} : vector<64x32xbf16>, vector<32x16xbf16>, vector<64x16xf32> -> vector<64x16xf32>
    %cst_37 = arith.constant dense<0.000000e+00> : vector<16xf32>
    %66 = vector.multi_reduction <add>, %65, %cst_37 [0] : vector<64x16xf32> to vector<16xf32>
    %67 = vector.shape_cast %66 : vector<16xf32> to vector<1x16xf32>
    %68 = arith.addf %52, %67 : vector<1x16xf32>
    %69 = arith.mulf %65, %65 : vector<64x16xf32>
    %cst_38 = arith.constant dense<0.000000e+00> : vector<16xf32>
    %70 = vector.multi_reduction <add>, %69, %cst_38 [0] : vector<64x16xf32> to vector<16xf32>
    %71 = vector.shape_cast %70 : vector<16xf32> to vector<1x16xf32>
    %72 = arith.addf %56, %71 : vector<1x16xf32>
    %73 = tpu.concatenate %68, %72 in 0 : vector<1x16xf32>, vector<1x16xf32> -> vector<2x16xf32>
    %c0_39 = arith.constant 0 : index
    %c0_40 = arith.constant 0 : index
    %c0_41 = arith.constant 0 : index
    %c0_42 = arith.constant 0 : index
    %74 = vector.load %arg6[%c0_39, %c0_40, %c0_41, %c0_42] : memref<1x1x2x16xf32, #tpu.memory_space<vmem>>, vector<1x1x2x16xf32>
    %75 = vector.shape_cast %74 : vector<1x1x2x16xf32> to vector<2x16xf32>
    %76 = vector.shape_cast %73 : vector<2x16xf32> to vector<1x1x2x16xf32>
    tpu.vector_store %arg6[%c0_39, %c0_40, %c0_41, %c0_42], %76 {strides = array<i32>} : memref<1x1x2x16xf32, #tpu.memory_space<vmem>>, vector<1x1x2x16xf32>,
    return
  }
  func.func @transform_0(%arg0: i32, %arg1: i32) -> (i32, i32, i32, i32) {
    %c0_i32 = arith.constant 0 : i32
    %c0_i32_0 = arith.constant 0 : i32
    %c0_i32_1 = arith.constant 0 : i32
    return %arg0, %arg1, %c0_i32, %c0_i32_0 : i32, i32, i32, i32
  }
  func.func @transform_1(%arg0: i32, %arg1: i32) -> (i32, i32, i32, i32) {
    %c1_i32 = arith.constant 1 : i32
    %0 = arith.addi %arg1, %c1_i32 : i32
    %c8_i32 = arith.constant 8 : i32
    %1 = arith.muli %0, %c8_i32 : i32
    %c0_i32 = arith.constant 0 : i32
    %c0_i32_0 = arith.constant 0 : i32
    %c0_i32_1 = arith.constant 0 : i32
    return %arg0, %1, %c0_i32, %c0_i32_0 : i32, i32, i32, i32
  }
  func.func @transform_2(%arg0: i32, %arg1: i32) -> (i32, i32, i32, i32) {
    %c1_i32 = arith.constant 1 : i32
    %0 = arith.addi %arg1, %c1_i32 : i32
    %c8_i32 = arith.constant 8 : i32
    %1 = arith.muli %0, %c8_i32 : i32
    %c1_i32_0 = arith.constant 1 : i32
    %2 = arith.addi %1, %c1_i32_0 : i32
    %c0_i32 = arith.constant 0 : i32
    %c0_i32_1 = arith.constant 0 : i32
    %c0_i32_2 = arith.constant 0 : i32
    return %arg0, %2, %c0_i32, %c0_i32_1 : i32, i32, i32, i32
  }
  func.func @transform_3(%arg0: i32, %arg1: i32) -> (i32, i32, i32, i32) {
    %c0_i32 = arith.constant 0 : i32
    %c0_i32_0 = arith.constant 0 : i32
    %c0_i32_1 = arith.constant 0 : i32
    %c0_i32_2 = arith.constant 0 : i32
    %c0_i32_3 = arith.constant 0 : i32
    return %c0_i32, %c0_i32_0, %c0_i32_1, %c0_i32_2 : i32, i32, i32, i32
  }
  func.func @transform_4(%arg0: i32, %arg1: i32) -> (i32, i32, i32, i32) {
    %c0_i32 = arith.constant 0 : i32
    %c0_i32_0 = arith.constant 0 : i32
    %c0_i32_1 = arith.constant 0 : i32
    return %arg0, %arg1, %c0_i32, %c0_i32_0 : i32, i32, i32, i32
  }
}

module attributes {stable_mosaic.version = 11 : i64} {
  func.func @_apply_kernel(%arg0: i32, %arg1: i32, %arg2: memref<1x8x10x8xbf16, #tpu.memory_space<vmem>>, %arg3: memref<1x1x10x8xbf16, #tpu.memory_space<vmem>>, %arg4: memref<1x1x10x8xbf16, #tpu.memory_space<vmem>>, %arg5: memref<2x2x32x16xbf16, #tpu.memory_space<vmem>>, %arg6: memref<1x16xf32, #tpu.memory_space<vmem>>, %arg7: memref<1x16xf32, #tpu.memory_space<vmem>>, %arg8: memref<1x4x8x8x16xf32, #tpu.memory_space<vmem>>) attributes {dimension_semantics = [#tpu.dimension_semantics<parallel>, #tpu.dimension_semantics<parallel>], iteration_bounds = array<i64: 2, 1>, scalar_prefetch = 0 : i64, scratch_operands = 0 : i64, tpu.core_type = #tpu.core_type<tc>, window_params = [{transform_indices = @transform_0, window_bounds = array<i64: 1, 8, 10, 8>}, {transform_indices = @transform_1, window_bounds = array<i64: 1, 1, 10, 8>}, {transform_indices = @transform_2, window_bounds = array<i64: 1, 1, 10, 8>}, {pipeline_mode = #tpu.pipeline_mode<synchronous>, transform_indices = @transform_3, window_bounds = array<i64: 2, 2, 32, 16>}, {pipeline_mode = #tpu.pipeline_mode<synchronous>, transform_indices = @transform_4, window_bounds = array<i64: 1, 16>}, {pipeline_mode = #tpu.pipeline_mode<synchronous>, transform_indices = @transform_5, window_bounds = array<i64: 1, 16>}, {transform_indices = @transform_6, window_bounds = array<i64: 1, 4, 8, 8, 16>}]} {
    %c0 = arith.constant 0 : index
    %c0_0 = arith.constant 0 : index
    %0 = vector.load %arg6[%c0, %c0_0] : memref<1x16xf32, #tpu.memory_space<vmem>>, vector<1x16xf32>
    %c0_1 = arith.constant 0 : index
    %c0_2 = arith.constant 0 : index
    %1 = vector.load %arg7[%c0_1, %c0_2] : memref<1x16xf32, #tpu.memory_space<vmem>>, vector<1x16xf32>
    %c0_3 = arith.constant 0 : index
    %c0_4 = arith.constant 0 : index
    %c0_5 = arith.constant 0 : index
    %c0_6 = arith.constant 0 : index
    %2 = vector.load %arg2[%c0_3, %c0_4, %c0_5, %c0_6] : memref<1x8x10x8xbf16, #tpu.memory_space<vmem>>, vector<1x8x10x8xbf16>
    %3 = vector.shape_cast %2 : vector<1x8x10x8xbf16> to vector<8x10x8xbf16>
    %c0_7 = arith.constant 0 : index
    %c0_8 = arith.constant 0 : index
    %c0_9 = arith.constant 0 : index
    %c0_10 = arith.constant 0 : index
    %4 = vector.load %arg3[%c0_7, %c0_8, %c0_9, %c0_10] : memref<1x1x10x8xbf16, #tpu.memory_space<vmem>>, vector<1x1x10x8xbf16>
    %5 = vector.shape_cast %4 : vector<1x1x10x8xbf16> to vector<1x10x8xbf16>
    %c0_11 = arith.constant 0 : index
    %c0_12 = arith.constant 0 : index
    %c0_13 = arith.constant 0 : index
    %c0_14 = arith.constant 0 : index
    %6 = vector.load %arg4[%c0_11, %c0_12, %c0_13, %c0_14] : memref<1x1x10x8xbf16, #tpu.memory_space<vmem>>, vector<1x1x10x8xbf16>
    %7 = vector.shape_cast %6 : vector<1x1x10x8xbf16> to vector<1x10x8xbf16>
    %8 = tpu.concatenate %3, %5, %7 in 0 : vector<8x10x8xbf16>, vector<1x10x8xbf16>, vector<1x10x8xbf16> -> vector<10x10x8xbf16>
    %9 = vector.extract_strided_slice %8 {offsets = [1, 1, 0], sizes = [8, 8, 8], strides = [1, 1, 1]} : vector<10x10x8xbf16> to vector<8x8x8xbf16>
    %10 = vector.extract_strided_slice %8 {offsets = [1, 0, 0], sizes = [8, 8, 8], strides = [1, 1, 1]} : vector<10x10x8xbf16> to vector<8x8x8xbf16>
    %11 = vector.extract_strided_slice %8 {offsets = [0, 1, 0], sizes = [8, 8, 8], strides = [1, 1, 1]} : vector<10x10x8xbf16> to vector<8x8x8xbf16>
    %12 = vector.extract_strided_slice %8 {offsets = [0, 0, 0], sizes = [8, 8, 8], strides = [1, 1, 1]} : vector<10x10x8xbf16> to vector<8x8x8xbf16>
    %13 = tpu.concatenate %9, %10, %11, %12 in 2 : vector<8x8x8xbf16>, vector<8x8x8xbf16>, vector<8x8x8xbf16>, vector<8x8x8xbf16> -> vector<8x8x32xbf16>
    %14 = vector.shape_cast %13 : vector<8x8x32xbf16> to vector<64x32xbf16>
    %c0_15 = arith.constant 0 : index
    %c0_16 = arith.constant 0 : index
    %c0_17 = arith.constant 0 : index
    %c0_18 = arith.constant 0 : index
    %15 = vector.load %arg5[%c0_15, %c0_16, %c0_17, %c0_18] : memref<2x2x32x16xbf16, #tpu.memory_space<vmem>>, vector<1x1x32x16xbf16>
    %16 = vector.shape_cast %15 : vector<1x1x32x16xbf16> to vector<32x16xbf16>
    %cst = arith.constant dense<0.000000e+00> : vector<64x16xf32>
    %17 = tpu.matmul %14, %16, %cst {dimension_numbers = #tpu.dot_dimension_numbers<[1], [0], [0], [1], [0, 0, 1, 1], [], []>} : vector<64x32xbf16>, vector<32x16xbf16>, vector<64x16xf32> -> vector<64x16xf32>
    %18 = vector.broadcast %0 : vector<1x16xf32> to vector<64x16xf32>
    %19 = arith.mulf %17, %18 : vector<64x16xf32>
    %20 = vector.broadcast %1 : vector<1x16xf32> to vector<64x16xf32>
    %21 = arith.addf %19, %20 : vector<64x16xf32>
    %cst_19 = arith.constant 0.000000e+00 : f32
    %22 = vector.broadcast %cst_19 : f32 to vector<64x16xf32>
    %23 = arith.maximumf %21, %22 : vector<64x16xf32>
    %24 = vector.shape_cast %23 : vector<64x16xf32> to vector<8x8x16xf32>
    %c0_20 = arith.constant 0 : index
    %c0_21 = arith.constant 0 : index
    %c0_22 = arith.constant 0 : index
    %c0_23 = arith.constant 0 : index
    %c0_24 = arith.constant 0 : index
    %25 = vector.load %arg8[%c0_20, %c0_21, %c0_22, %c0_23, %c0_24] : memref<1x4x8x8x16xf32, #tpu.memory_space<vmem>>, vector<1x1x8x8x16xf32>
    %26 = vector.shape_cast %25 : vector<1x1x8x8x16xf32> to vector<8x8x16xf32>
    %27 = vector.shape_cast %24 : vector<8x8x16xf32> to vector<1x1x8x8x16xf32>
    tpu.vector_store %arg8[%c0_20, %c0_21, %c0_22, %c0_23, %c0_24], %27 {strides = array<i32>} : memref<1x4x8x8x16xf32, #tpu.memory_space<vmem>>, vector<1x1x8x8x16xf32>,
    %28 = vector.extract_strided_slice %8 {offsets = [1, 2, 0], sizes = [8, 8, 8], strides = [1, 1, 1]} : vector<10x10x8xbf16> to vector<8x8x8xbf16>
    %29 = vector.extract_strided_slice %8 {offsets = [1, 1, 0], sizes = [8, 8, 8], strides = [1, 1, 1]} : vector<10x10x8xbf16> to vector<8x8x8xbf16>
    %30 = vector.extract_strided_slice %8 {offsets = [0, 2, 0], sizes = [8, 8, 8], strides = [1, 1, 1]} : vector<10x10x8xbf16> to vector<8x8x8xbf16>
    %31 = vector.extract_strided_slice %8 {offsets = [0, 1, 0], sizes = [8, 8, 8], strides = [1, 1, 1]} : vector<10x10x8xbf16> to vector<8x8x8xbf16>
    %32 = tpu.concatenate %28, %29, %30, %31 in 2 : vector<8x8x8xbf16>, vector<8x8x8xbf16>, vector<8x8x8xbf16>, vector<8x8x8xbf16> -> vector<8x8x32xbf16>
    %33 = vector.shape_cast %32 : vector<8x8x32xbf16> to vector<64x32xbf16>
    %c0_25 = arith.constant 0 : index
    %c1 = arith.constant 1 : index
    %c0_26 = arith.constant 0 : index
    %c0_27 = arith.constant 0 : index
    %34 = vector.load %arg5[%c0_25, %c1, %c0_26, %c0_27] : memref<2x2x32x16xbf16, #tpu.memory_space<vmem>>, vector<1x1x32x16xbf16>
    %35 = vector.shape_cast %34 : vector<1x1x32x16xbf16> to vector<32x16xbf16>
    %cst_28 = arith.constant dense<0.000000e+00> : vector<64x16xf32>
    %36 = tpu.matmul %33, %35, %cst_28 {dimension_numbers = #tpu.dot_dimension_numbers<[1], [0], [0], [1], [0, 0, 1, 1], [], []>} : vector<64x32xbf16>, vector<32x16xbf16>, vector<64x16xf32> -> vector<64x16xf32>
    %37 = vector.broadcast %0 : vector<1x16xf32> to vector<64x16xf32>
    %38 = arith.mulf %36, %37 : vector<64x16xf32>
    %39 = vector.broadcast %1 : vector<1x16xf32> to vector<64x16xf32>
    %40 = arith.addf %38, %39 : vector<64x16xf32>
    %cst_29 = arith.constant 0.000000e+00 : f32
    %41 = vector.broadcast %cst_29 : f32 to vector<64x16xf32>
    %42 = arith.maximumf %40, %41 : vector<64x16xf32>
    %43 = vector.shape_cast %42 : vector<64x16xf32> to vector<8x8x16xf32>
    %c0_30 = arith.constant 0 : index
    %c1_31 = arith.constant 1 : index
    %c0_32 = arith.constant 0 : index
    %c0_33 = arith.constant 0 : index
    %c0_34 = arith.constant 0 : index
    %44 = vector.load %arg8[%c0_30, %c1_31, %c0_32, %c0_33, %c0_34] : memref<1x4x8x8x16xf32, #tpu.memory_space<vmem>>, vector<1x1x8x8x16xf32>
    %45 = vector.shape_cast %44 : vector<1x1x8x8x16xf32> to vector<8x8x16xf32>
    %46 = vector.shape_cast %43 : vector<8x8x16xf32> to vector<1x1x8x8x16xf32>
    tpu.vector_store %arg8[%c0_30, %c1_31, %c0_32, %c0_33, %c0_34], %46 {strides = array<i32>} : memref<1x4x8x8x16xf32, #tpu.memory_space<vmem>>, vector<1x1x8x8x16xf32>,
    %47 = vector.extract_strided_slice %8 {offsets = [2, 1, 0], sizes = [8, 8, 8], strides = [1, 1, 1]} : vector<10x10x8xbf16> to vector<8x8x8xbf16>
    %48 = vector.extract_strided_slice %8 {offsets = [2, 0, 0], sizes = [8, 8, 8], strides = [1, 1, 1]} : vector<10x10x8xbf16> to vector<8x8x8xbf16>
    %49 = vector.extract_strided_slice %8 {offsets = [1, 1, 0], sizes = [8, 8, 8], strides = [1, 1, 1]} : vector<10x10x8xbf16> to vector<8x8x8xbf16>
    %50 = vector.extract_strided_slice %8 {offsets = [1, 0, 0], sizes = [8, 8, 8], strides = [1, 1, 1]} : vector<10x10x8xbf16> to vector<8x8x8xbf16>
    %51 = tpu.concatenate %47, %48, %49, %50 in 2 : vector<8x8x8xbf16>, vector<8x8x8xbf16>, vector<8x8x8xbf16>, vector<8x8x8xbf16> -> vector<8x8x32xbf16>
    %52 = vector.shape_cast %51 : vector<8x8x32xbf16> to vector<64x32xbf16>
    %c1_35 = arith.constant 1 : index
    %c0_36 = arith.constant 0 : index
    %c0_37 = arith.constant 0 : index
    %c0_38 = arith.constant 0 : index
    %53 = vector.load %arg5[%c1_35, %c0_36, %c0_37, %c0_38] : memref<2x2x32x16xbf16, #tpu.memory_space<vmem>>, vector<1x1x32x16xbf16>
    %54 = vector.shape_cast %53 : vector<1x1x32x16xbf16> to vector<32x16xbf16>
    %cst_39 = arith.constant dense<0.000000e+00> : vector<64x16xf32>
    %55 = tpu.matmul %52, %54, %cst_39 {dimension_numbers = #tpu.dot_dimension_numbers<[1], [0], [0], [1], [0, 0, 1, 1], [], []>} : vector<64x32xbf16>, vector<32x16xbf16>, vector<64x16xf32> -> vector<64x16xf32>
    %56 = vector.broadcast %0 : vector<1x16xf32> to vector<64x16xf32>
    %57 = arith.mulf %55, %56 : vector<64x16xf32>
    %58 = vector.broadcast %1 : vector<1x16xf32> to vector<64x16xf32>
    %59 = arith.addf %57, %58 : vector<64x16xf32>
    %cst_40 = arith.constant 0.000000e+00 : f32
    %60 = vector.broadcast %cst_40 : f32 to vector<64x16xf32>
    %61 = arith.maximumf %59, %60 : vector<64x16xf32>
    %62 = vector.shape_cast %61 : vector<64x16xf32> to vector<8x8x16xf32>
    %c0_41 = arith.constant 0 : index
    %c2 = arith.constant 2 : index
    %c0_42 = arith.constant 0 : index
    %c0_43 = arith.constant 0 : index
    %c0_44 = arith.constant 0 : index
    %63 = vector.load %arg8[%c0_41, %c2, %c0_42, %c0_43, %c0_44] : memref<1x4x8x8x16xf32, #tpu.memory_space<vmem>>, vector<1x1x8x8x16xf32>
    %64 = vector.shape_cast %63 : vector<1x1x8x8x16xf32> to vector<8x8x16xf32>
    %65 = vector.shape_cast %62 : vector<8x8x16xf32> to vector<1x1x8x8x16xf32>
    tpu.vector_store %arg8[%c0_41, %c2, %c0_42, %c0_43, %c0_44], %65 {strides = array<i32>} : memref<1x4x8x8x16xf32, #tpu.memory_space<vmem>>, vector<1x1x8x8x16xf32>,
    %66 = vector.extract_strided_slice %8 {offsets = [2, 2, 0], sizes = [8, 8, 8], strides = [1, 1, 1]} : vector<10x10x8xbf16> to vector<8x8x8xbf16>
    %67 = vector.extract_strided_slice %8 {offsets = [2, 1, 0], sizes = [8, 8, 8], strides = [1, 1, 1]} : vector<10x10x8xbf16> to vector<8x8x8xbf16>
    %68 = vector.extract_strided_slice %8 {offsets = [1, 2, 0], sizes = [8, 8, 8], strides = [1, 1, 1]} : vector<10x10x8xbf16> to vector<8x8x8xbf16>
    %69 = vector.extract_strided_slice %8 {offsets = [1, 1, 0], sizes = [8, 8, 8], strides = [1, 1, 1]} : vector<10x10x8xbf16> to vector<8x8x8xbf16>
    %70 = tpu.concatenate %66, %67, %68, %69 in 2 : vector<8x8x8xbf16>, vector<8x8x8xbf16>, vector<8x8x8xbf16>, vector<8x8x8xbf16> -> vector<8x8x32xbf16>
    %71 = vector.shape_cast %70 : vector<8x8x32xbf16> to vector<64x32xbf16>
    %c1_45 = arith.constant 1 : index
    %c1_46 = arith.constant 1 : index
    %c0_47 = arith.constant 0 : index
    %c0_48 = arith.constant 0 : index
    %72 = vector.load %arg5[%c1_45, %c1_46, %c0_47, %c0_48] : memref<2x2x32x16xbf16, #tpu.memory_space<vmem>>, vector<1x1x32x16xbf16>
    %73 = vector.shape_cast %72 : vector<1x1x32x16xbf16> to vector<32x16xbf16>
    %cst_49 = arith.constant dense<0.000000e+00> : vector<64x16xf32>
    %74 = tpu.matmul %71, %73, %cst_49 {dimension_numbers = #tpu.dot_dimension_numbers<[1], [0], [0], [1], [0, 0, 1, 1], [], []>} : vector<64x32xbf16>, vector<32x16xbf16>, vector<64x16xf32> -> vector<64x16xf32>
    %75 = vector.broadcast %0 : vector<1x16xf32> to vector<64x16xf32>
    %76 = arith.mulf %74, %75 : vector<64x16xf32>
    %77 = vector.broadcast %1 : vector<1x16xf32> to vector<64x16xf32>
    %78 = arith.addf %76, %77 : vector<64x16xf32>
    %cst_50 = arith.constant 0.000000e+00 : f32
    %79 = vector.broadcast %cst_50 : f32 to vector<64x16xf32>
    %80 = arith.maximumf %78, %79 : vector<64x16xf32>
    %81 = vector.shape_cast %80 : vector<64x16xf32> to vector<8x8x16xf32>
    %c0_51 = arith.constant 0 : index
    %c3 = arith.constant 3 : index
    %c0_52 = arith.constant 0 : index
    %c0_53 = arith.constant 0 : index
    %c0_54 = arith.constant 0 : index
    %82 = vector.load %arg8[%c0_51, %c3, %c0_52, %c0_53, %c0_54] : memref<1x4x8x8x16xf32, #tpu.memory_space<vmem>>, vector<1x1x8x8x16xf32>
    %83 = vector.shape_cast %82 : vector<1x1x8x8x16xf32> to vector<8x8x16xf32>
    %84 = vector.shape_cast %81 : vector<8x8x16xf32> to vector<1x1x8x8x16xf32>
    tpu.vector_store %arg8[%c0_51, %c3, %c0_52, %c0_53, %c0_54], %84 {strides = array<i32>} : memref<1x4x8x8x16xf32, #tpu.memory_space<vmem>>, vector<1x1x8x8x16xf32>,
    return
  }
  func.func @transform_0(%arg0: i32, %arg1: i32) -> (i32, i32, i32, i32) {
    %c0_i32 = arith.constant 0 : i32
    %c0_i32_0 = arith.constant 0 : i32
    %c0_i32_1 = arith.constant 0 : i32
    return %arg0, %arg1, %c0_i32, %c0_i32_0 : i32, i32, i32, i32
  }
  func.func @transform_1(%arg0: i32, %arg1: i32) -> (i32, i32, i32, i32) {
    %c1_i32 = arith.constant 1 : i32
    %0 = arith.addi %arg1, %c1_i32 : i32
    %c8_i32 = arith.constant 8 : i32
    %1 = arith.muli %0, %c8_i32 : i32
    %c0_i32 = arith.constant 0 : i32
    %c0_i32_0 = arith.constant 0 : i32
    %c0_i32_1 = arith.constant 0 : i32
    return %arg0, %1, %c0_i32, %c0_i32_0 : i32, i32, i32, i32
  }
  func.func @transform_2(%arg0: i32, %arg1: i32) -> (i32, i32, i32, i32) {
    %c1_i32 = arith.constant 1 : i32
    %0 = arith.addi %arg1, %c1_i32 : i32
    %c8_i32 = arith.constant 8 : i32
    %1 = arith.muli %0, %c8_i32 : i32
    %c1_i32_0 = arith.constant 1 : i32
    %2 = arith.addi %1, %c1_i32_0 : i32
    %c0_i32 = arith.constant 0 : i32
    %c0_i32_1 = arith.constant 0 : i32
    %c0_i32_2 = arith.constant 0 : i32
    return %arg0, %2, %c0_i32, %c0_i32_1 : i32, i32, i32, i32
  }
  func.func @transform_3(%arg0: i32, %arg1: i32) -> (i32, i32, i32, i32) {
    %c0_i32 = arith.constant 0 : i32
    %c0_i32_0 = arith.constant 0 : i32
    %c0_i32_1 = arith.constant 0 : i32
    %c0_i32_2 = arith.constant 0 : i32
    %c0_i32_3 = arith.constant 0 : i32
    return %c0_i32, %c0_i32_0, %c0_i32_1, %c0_i32_2 : i32, i32, i32, i32
  }
  func.func @transform_4(%arg0: i32, %arg1: i32) -> (i32, i32) {
    %c0_i32 = arith.constant 0 : i32
    %c0_i32_0 = arith.constant 0 : i32
    %c0_i32_1 = arith.constant 0 : i32
    return %c0_i32, %c0_i32_0 : i32, i32
  }
  func.func @transform_5(%arg0: i32, %arg1: i32) -> (i32, i32) {
    %c0_i32 = arith.constant 0 : i32
    %c0_i32_0 = arith.constant 0 : i32
    %c0_i32_1 = arith.constant 0 : i32
    return %c0_i32, %c0_i32_0 : i32, i32
  }
  func.func @transform_6(%arg0: i32, %arg1: i32) -> (i32, i32, i32, i32, i32) {
    %c0_i32 = arith.constant 0 : i32
    %c0_i32_0 = arith.constant 0 : i32
    %c0_i32_1 = arith.constant 0 : i32
    %c0_i32_2 = arith.constant 0 : i32
    return %arg0, %c0_i32, %arg1, %c0_i32_0, %c0_i32_1 : i32, i32, i32, i32, i32
  }
}

</mosaic_0001>

<bundles_post_ra>
// kernel: unet_up_forward.3
= control target key start
LH: loop header
LB: loop body
LE: loop exit
PB: predicated region body
PF: predicated region fallthrough
CT: control target
= control target key end

     0   :  { %s2132_s21 = smov 0   ;;  %s2134_s22 = smov 0   ;;  %s2692_s0 = inlined_call_operand.vmem [shape: bf16[2,10,10,8], index: 0, kind: input, shape index: {}, may-alias: {0,1,2}]   ;;  %s2693_s1 = inlined_call_operand.vmem [shape: bf16[2,10,10,8], index: 1, kind: input, shape index: {}, may-alias: {0,1,2}]   ;;  %s2694_s2 = inlined_call_operand.vmem [shape: bf16[2,10,10,8], index: 2, kind: input, shape index: {}, may-alias: {0,1,2}]   ;;  %s2695_s3 = inlined_call_operand.vmem [shape: bf16[2,2,32,16], index: 3, kind: input, shape index: {}]   ;;  %s2696_s4 = inlined_call_operand.vmem [shape: f32[1,16], index: 4, kind: input, shape index: {}]   ;;  %s2697_s5 = inlined_call_operand.vmem [shape: f32[1,16], index: 5, kind: input, shape index: {}]   ;;  %s2698_s6 = inlined_call_operand.vmem [shape: f32[2,4,8,8,16], index: 6, kind: output, shape index: {}]  }
   0x1   :  { %s2136_s23 = smov 0  }
   0x2 LB: > { %s28_s24 = sadd.s32 1, %s2088_s22  ;;  %p1784_p0 = scmp.ge.s32.totalorder %s2092_s23, 1  ;;  %s2092_s23 = sphi %s2136_s23, %s16_s23   ;;  %s2088_s22 = sphi %s2134_s22, %s2704_s22   ;;  %s2084_s21 = sphi %s2132_s21, %s2703_s21  }
   0x3   : > { %p30_p1 = scmp.ge.s32.totalorder %s28_s24, 2  ;;  %p296_p2 = scmp.lt.s32.totalorder %s2092_s23, 3 }
   0x5   : > { %s2706_s24 = smov (%p30_p1, %s28_s24), 0  ;;  %p297_p3 = pnand %p1784_p0, %p296_p2 }
   0x6   : > { %p369_p4 = scmp.lt.s32.totalorder (!%p297_p3), %s2084_s21, 1  ;;  %s2094_s29 = smov (!%p297_p3), 16   ;;  %v2062_v44 = vld [vmem:[%s2695_s3] sm:$0xff] (!%p297_p3)   ;;  %v2063_v53 = vld [vmem:[%s2695_s3 + $0x8] sm:$0xff] (!%p297_p3)   ;;  %vm610_vm0 = vcmask (!%p297_p3), 64512   ;;  %vm635_vm1 = vcmask (!%p297_p3), 130048  }
   0x7   : > { %300 = sbr.rel (%p297_p3) target bundleno = 459 (0x1cb), region = 44  ;;  %s2095_s30 = smov (!%p297_p3), 8   ;;  %1964 = vmatprep.subr.bf16.mxu0 (!%p297_p3), %v2062_v44  ;;  %vm652_vm2 = vcmask (!%p297_p3), 195584   ;;  %vm709_vm3 = vsmask.f32 (!%p297_p3), 3328  ;;  %vm852_vm6 = vcmask (!%p297_p3), 261120  }
   0x8   : > { %s2096_s10 = smov (!%p297_p3), 24   ;;  %1965 = vmatpush3.bf16.msra.mxu0 (!%p297_p3), %v2062_v44  ;;  %vm710_vm4 = vsmask.f32 (!%p297_p3), 7440  ;;  %vm1141_vm7 = vcmask (!%p297_p3), 1042432   ;;  %vm1142_vm8 = vcmask (!%p297_p3), 1046532  }
   0x9   : > { %1966 = vmatprep.subr.bf16.mxu0 (!%p297_p3), %v2063_v53  ;;  %vm2359_vm5 = vmor (!%p297_p3), %vm709_vm3, %vm710_vm4 }
   0xa   : > { %vm2395_vm9 = vmor (!%p297_p3), %vm1141_vm7, %vm1142_vm8 }
   0xc   : > { %1967 = vmatpush3.bf16.msra.mxu0 (!%p297_p3), %v2063_v53 }
   0xe   : > { %s2708_s21 = smov (!%p369_p4, %s2084_s21), 1 }
   0xf   : > { %s2153_s25 = smul.u32 80, %s2708_s21  ;;  %s1939_s16 = sshll.u32 %s2708_s21, 8 }
  0x10   : > { %s2557_s19 = scalar_lea.vmem %s2698_s6, %s1939_s16 }
  0x11   : > { %s2159_s28 = scalar_lea.vmem %s2692_s0, %s2153_s25  ;;  %s1936_s9 = sadd.s32 64, %s2153_s25 }
  0x12   : > { %v427_v0 = vld [vmem:[%s2159_s28 + $0x8] sm:$0xf]  ;;  %v428_v1 = vld [vmem:[%s2159_s28 + $0xc] sm:$0x1]  ;;  %v425_v2 = vld [vmem:[%s2159_s28] sm:$0xf]  ;;  %s2221_s13 = scalar_lea.vmem %s2693_s1, %s1936_s9 }
  0x13   : > { %v2164_v3 = vcombine.low %v427_v0, %v428_v1  ;;  %v426_v4 = vld [vmem:[%s2159_s28 + $0x4] sm:$0x1]  ;;  %v431_v5 = vld [vmem:[%s2159_s28 + $0x18] sm:$0xf]  ;;  %v432_v6 = vld [vmem:[%s2159_s28 + $0x1c] sm:$0x1]  ;;  %v1798_v7 = vcombine.low %v427_v0, %v427_v0  ;;  %v1807_v9 = vcombine.low %v425_v2, %v425_v2 }
  0x14   : > { %v2169_v8 = vcombine.low %v425_v2, %v426_v4  ;;  %v429_v10 = vld [vmem:[%s2159_s28 + $0x10] sm:$0xf]  ;;  %v430_v11 = vld [vmem:[%s2159_s28 + $0x14] sm:$0x1]  ;;  %v1800_v12 = vcombine.low %v431_v5, %v431_v5  ;;  %v433_v13 = vld [vmem:[%s2159_s28 + $0x20] sm:$0xf]  ;;  %v2176_v14 = vcombine.low %v431_v5, %v432_v6 }
  0x15   : > { %572 = vrot.lane.b32.xlu1 %v2164_v3, %s2094_s29  ;;  %v2178_v15 = vcombine.low %v429_v10, %v430_v11  ;;  %v494_v16 = vshrl.u32 %v1798_v7, 16  ;;  %v1801_v17 = vcombine.low %v433_v13, %v433_v13  ;;  %v497_v20 = vshll.u32 %v1798_v7, 16  ;;  %v434_v34 = vld [vmem:[%s2159_s28 + $0x24] sm:$0x1]  ;;  %v2199_v42 = vld [vmem:[%s2159_s28 + $0x30] sm:$0xf] }
  0x16   : > { %570 = vrot.lane.b32.xlu0 %v2169_v8, %s2094_s29  ;;  %v508_v18 = vshrl.u32 %v1800_v12, 16  ;;  %v511_v19 = vshll.u32 %v1800_v12, 16  ;;  %v1799_v21 = vcombine.low %v429_v10, %v429_v10  ;;  %v588_v28 = vshrl.u32 %v1807_v9, 16  ;;  %v2202_v43 = vld [vmem:[%s2159_s28 + $0x28] sm:$0xf]  ;;  %s1938_s20 = sadd.s32 72, %s2153_s25 }
  0x17   : > { %v496_v22 = vrot.slane %v494_v16, 7  ;;  %v515_v23 = vshrl.u32 %v1801_v17, 16  ;;  %v518_v27 = vshll.u32 %v1801_v17, 16  ;;  %v591_v37 = vshll.u32 %v1807_v9, 16  ;;  %v441_v62 = vld [vmem:[%s2221_s13] sm:$0xf] }
  0x18   : > { %v510_v24 = vrot.slane %v508_v18, 7  ;;  %v501_v25 = vshrl.u32 %v1799_v21, 16  ;;  %v504_v32 = vshll.u32 %v1799_v21, 16  ;;  %v590_v36 = vrot.slane %v588_v28, 7  ;;  %v439_v63 = vld [vmem:[%s2159_s28 + $0x38] sm:$0xf] }
  0x19   : > { %576 = vrot.lane.b32.xlu1 %v2176_v14, %s2094_s29  ;;  %v517_v26 = vrot.slane %v515_v23, 7  ;;  %v499_v30 = vor.u32 %v497_v20, %v496_v22  ;;  %v2191_v38 = vcombine.low %v433_v13, %v434_v34  ;;  %v980_v39 = vshrl.u32 %v2178_v15, 16  ;;  %v2065_v28 = vld [vmem:[%s2695_s3 + $0x18] sm:$0xff]   ;;  %v442_v34 = vld [vmem:[%s2221_s13 + $0x4] sm:$0x1] }
  0x1a   : > { %574 = vrot.lane.b32.xlu0 %v2178_v15, %s2094_s29  ;;  %v513_v29 = vor.u32 %v511_v19, %v510_v24  ;;  %v503_v31 = vrot.slane %v501_v25, 7  ;;  %v593_v40 = vor.u32 %v591_v37, %v590_v36  ;;  %v974_v41 = vshrl.u32 %v2164_v3, 16  ;;  %v436_v25 = vld [vmem:[%s2159_s28 + $0x2c] sm:$0x1] }
  0x1b   : > { %v2187_v33 = vor.u32 %v518_v27, %v517_v26  ;;  %v982_v45 = vrot.slane %v980_v39, 7  ;;  %v983_v46 = vshll.u32 %v2178_v15, 16  ;;  %v992_v47 = vshrl.u32 %v2191_v38, 16  ;;  %v2064_v26 = vld [vmem:[%s2695_s3 + $0x10] sm:$0xff]  }
  0x1c   : > { %v506_v35 = vor.u32 %v504_v32, %v503_v31  ;;  %v1803_v48 = vcombine.low %v2199_v42, %v2199_v42  ;;  %v976_v49 = vrot.slane %v974_v41, 7  ;;  %v977_v50 = vshll.u32 %v2164_v3, 16  ;;  %1976 = vmatprep.subr.bf16.mxu1 %v2064_v26 }
  0x1d   : > { %553 = vrot.lane.b32.xlu1 %v513_v29, %s2095_s30  ;;  %v986_v51 = vshrl.u32 %v2176_v14, 16  ;;  %v1802_v52 = vcombine.low %v2202_v43, %v2202_v43  ;;  %v985_v54 = vor.u32 %v983_v46, %v982_v45  ;;  %v994_v55 = vrot.slane %v992_v47, 7  ;;  %1977 = vmatpush3.bf16.msra.mxu1 %v2064_v26 }
  0x1e   : > { %549 = vrot.lane.b32.xlu0 %v499_v30, %s2095_s30  ;;  %v995_v56 = vshll.u32 %v2191_v38, 16  ;;  %v529_v57 = vshrl.u32 %v1803_v48, 16  ;;  %v979_v58 = vor.u32 %v977_v50, %v976_v49  ;;  %v989_v60 = vshll.u32 %v2176_v14, 16  ;;  %1978 = vmatprep.subr.bf16.mxu1 %v2065_v28 }
  0x1f   : > { %v988_v59 = vrot.slane %v986_v51, 7  ;;  %v522_v61 = vshrl.u32 %v1802_v52, 16  ;;  %v1039_v0 = vshrl.u32 %v2169_v8, 16  ;;  %v532_v4 = vshll.u32 %v1803_v48, 16 }
  0x20   : > { %v2234_v1 = vor.u32 %v995_v56, %v994_v55  ;;  %v531_v2 = vrot.slane %v529_v57, 7  ;;  %v1805_v5 = vcombine.low %v441_v62, %v441_v62  ;;  %v525_v9 = vshll.u32 %v1802_v52, 16  ;;  %v2301_v52 = vld [vmem:[%s2695_s3 + $0x20] sm:$0xff]   ;;  %v2308_v56 = vld [vmem:[%s2695_s3 + $0x30] sm:$0xff]  }
  0x21   : > { %555 = vrot.lane.b32.xlu1 %v2187_v33, %s2095_s30  ;;  %v991_v6 = vor.u32 %v989_v60, %v988_v59  ;;  %v524_v7 = vrot.slane %v522_v61, 7  ;;  %v1804_v10 = vcombine.low %v439_v63, %v439_v63  ;;  %v1041_v16 = vrot.slane %v1039_v0, 7  ;;  %1979 = vmatpush3.bf16.msra.mxu1 %v2065_v28 }
  0x22   : > { %551 = vrot.lane.b32.xlu0 %v506_v35, %s2095_s30  ;;  %v534_v11 = vor.u32 %v532_v4, %v531_v2  ;;  %v543_v12 = vshrl.u32 %v1805_v5, 16  ;;  %v1042_v17 = vshll.u32 %v2169_v8, 16  ;;  %v546_v20 = vshll.u32 %v1805_v5, 16  ;;  %1988 = vmatprep.subr.bf16.mxu0 %v2301_v52 }
  0x23   : > { %v527_v13 = vor.u32 %v525_v9, %v524_v7  ;;  %v536_v18 = vshrl.u32 %v1804_v10, 16  ;;  %v539_v23 = vshll.u32 %v1804_v10, 16  ;;  %v2252_v27 = vcombine.low %v2202_v43, %v436_v25  ;;  %2000 = vmatprep.subr.bf16.mxu1 %v2308_v56 }
  0x24   : > { %v545_v19 = vrot.slane %v543_v12, 7  ;;  %v1044_v21 = vor.u32 %v1042_v17, %v1041_v16 }
  0x25   : > { %596 = vrot.lane.b32.xlu1 %v499_v30, %s2096_s10  ;;  %v538_v22 = vrot.slane %v536_v18, 7  ;;  %v438_v30 = vld [vmem:[%s2159_s28 + $0x34] sm:$0x1]  ;;  %v998_v37 = vshrl.u32 %v2252_v27, 16  ;;  %v1001_v43 = vshll.u32 %v2252_v27, 16 }
  0x26   : > { %594 = vrot.lane.b32.xlu0 %v593_v40, %s2096_s10  ;;  %v2244_v24 = vor.u32 %v546_v20, %v545_v19  ;;  %v2270_v32 = vcombine.low %v2199_v42, %v438_v30 }
  0x27   : > { %v541_v8 = vor.u32 %v539_v23, %v538_v22  ;;  %v1000_v42 = vrot.slane %v998_v37, 7 }
  0x28   : > { %v1004_v36 = vshrl.u32 %v2270_v32, 16  ;;  %v1007_v40 = vshll.u32 %v2270_v32, 16 }
  0x29   : > { %600 = vrot.lane.b32.xlu1 %v513_v29, %s2096_s10  ;;  %v440_v29 = vld [vmem:[%s2159_s28 + $0x3c] sm:$0x1]  ;;  %s408_s28 = scalar_lea.vmem %s2694_s2, %s1938_s20  ;;  %v1003_v48 = vor.u32 %v1001_v43, %v1000_v42 }
  0x2a   : > { %598 = vrot.lane.b32.xlu0 %v506_v35, %s2096_s10  ;;  %v2266_v31 = vcombine.low %v439_v63, %v440_v29  ;;  %v2274_v35 = vcombine.low %v441_v62, %v442_v34  ;;  %v1006_v39 = vrot.slane %v1004_v36, 7  ;;  %v443_v50 = vld [vmem:[%s408_s28] sm:$0xf] }
  0x2b   : > { %v1883_v55 = vcombine.low %v443_v50, %v443_v50 }
  0x2c   : > { %v1016_v41 = vshrl.u32 %v2274_v35, 16  ;;  %v1010_v44 = vshrl.u32 %v2266_v31, 16  ;;  %v1009_v45 = vor.u32 %v1007_v40, %v1006_v39  ;;  %v1019_v47 = vshll.u32 %v2274_v35, 16 }
  0x2d   : > { %1024 = vrot.lane.b32.xlu1 %v985_v54, %s2095_s30  ;;  %v1325_v61 = vshll.u32 %v1883_v55, 16 }
  0x2e   : > { %1022 = vrot.lane.b32.xlu0 %v979_v58, %s2095_s30  ;;  %v1018_v46 = vrot.slane %v1016_v41, 7  ;;  %v1012_v49 = vrot.slane %v1010_v44, 7 }
  0x30   : > { %v1021_v51 = vor.u32 %v1019_v47, %v1018_v46 }
  0x31   : > { %1028 = vrot.lane.b32.xlu1 %v2234_v1, %s2095_s30 }
  0x32   : > { %1026 = vrot.lane.b32.xlu0 %v991_v6, %s2095_s30 }
  0x35   : > { %559 = vrot.lane.b32.xlu1 %v534_v11, %s2095_s30 }
  0x36   : > { %557 = vrot.lane.b32.xlu0 %v527_v13, %s2095_s30 }
  0x39   : > { %1047 = vrot.lane.b32.xlu1 %v979_v58, %s2096_s10  ;;  %v1322_v58 = vshrl.u32 %v1883_v55, 16 }
  0x3a   : > { %1045 = vrot.lane.b32.xlu0 %v1044_v21, %s2096_s10 }
  0x3b   : > { %v1324_v60 = vrot.slane %v1322_v58, 7 }
  0x3d   : > { %563 = vrot.lane.b32.xlu1 %v2244_v24, %s2095_s30  ;;  %v1327_v0 = vor.u32 %v1325_v61, %v1324_v60 }
  0x3e   : > { %561 = vrot.lane.b32.xlu0 %v541_v8, %s2095_s30 }
  0x41   : > { %580 = vrot.lane.b32.xlu1 %v2252_v27, %s2094_s29 }
  0x42   : > { %578 = vrot.lane.b32.xlu0 %v2191_v38, %s2094_s29 }
  0x45   : > { %1051 = vrot.lane.b32.xlu1 %v991_v6, %s2096_s10 }
  0x46   : > { %1049 = vrot.lane.b32.xlu0 %v985_v54, %s2096_s10  ;;  %v444_v54 = vld [vmem:[%s408_s28 + $0x4] sm:$0x1] }
  0x47   : > { %v2311_v57 = vcombine.low %v443_v50, %v444_v54 }
  0x49   : > { %584 = vrot.lane.b32.xlu1 %v2266_v31, %s2094_s29  ;;  %v1492_v59 = vshrl.u32 %v2311_v57, 16  ;;  %v1495_v63 = vshll.u32 %v2311_v57, 16 }
  0x4a   : > { %582 = vrot.lane.b32.xlu0 %v2270_v32, %s2094_s29 }
  0x4b   : > { %v1494_v62 = vrot.slane %v1492_v59, 7 }
  0x4d   : > { %604 = vrot.lane.b32.xlu1 %v527_v13, %s2096_s10  ;;  %v1497_v2 = vor.u32 %v1495_v63, %v1494_v62 }
  0x4e   : > { %602 = vrot.lane.b32.xlu0 %v2187_v33, %s2096_s10  ;;  %v1013_v33 = vshll.u32 %v2266_v31, 16 }
  0x50   : > { %v1015_v53 = vor.u32 %v1013_v33, %v1012_v49 }
  0x51   : > { %608 = vrot.lane.b32.xlu1 %v541_v8, %s2096_s10 }
  0x52   : > { %606 = vrot.lane.b32.xlu0 %v534_v11, %s2096_s10 }
  0x55   : > { %1032 = vrot.lane.b32.xlu1 %v1009_v45, %s2095_s30 }
  0x56   : > { %1030 = vrot.lane.b32.xlu0 %v1003_v48, %s2095_s30 }
  0x59   : > { %1036 = vrot.lane.b32.xlu1 %v1021_v51, %s2095_s30 }
  0x5a   : > { %1034 = vrot.lane.b32.xlu0 %v1015_v53, %s2095_s30 }
  0x5d   : > { %1055 = vrot.lane.b32.xlu1 %v1003_v48, %s2096_s10 }
  0x5e   : > { %1053 = vrot.lane.b32.xlu0 %v2234_v1, %s2096_s10 }
  0x61   : > { %1059 = vrot.lane.b32.xlu1 %v1015_v53, %s2096_s10 }
  0x62   : > { %1057 = vrot.lane.b32.xlu0 %v1009_v45, %s2096_s10 }
  0x65   : > { %1330 = vrot.lane.b32.xlu1 %v2274_v35, %s2094_s29 }
  0x66   : > { %1328 = vrot.lane.b32.xlu0 %v1327_v0, %s2095_s30 }
  0x69   : > { %1498 = vrot.lane.b32.xlu1 %v1497_v2, %s2095_s30 }
  0x6a   : > { %1332 = vrot.lane.b32.xlu0 %v2244_v24, %s2096_s10 }
  0x6e   : > { %1500 = vrot.lane.b32.xlu0 %v1021_v51, %s2096_s10 }
  0x87   : > { %v2329_v1 = vpop.permute.xlu1 %572 }
  0x88   : > { %v2331_v4 = vpop.permute.xlu0 %570 }
  0x8b   : > { %v2333_v5 = vpop.permute.xlu1 %576 }
  0x8c   : > { %v2335_v6 = vpop.permute.xlu0 %574 }
  0x8f   : > { %v554_v7 = vpop.permute.xlu1 %553 }
  0x90   : > { %v550_v9 = vpop.permute.xlu0 %549  ;;  %v619_v22 = vsel %vm610_vm0, %v2176_v14, %v554_v7 }
  0x91   : > { %v613_v12 = vsel %vm610_vm0, %v2164_v3, %v550_v9  ;;  %v641_v40 = vsel %vm635_vm1, %v619_v22, %v2335_v6  ;;  %v2547_v9 = vld [vmem:[%s2697_s5] ss:$0 sm:$0xff] }
  0x92   : > { %v637_v20 = vsel %vm635_vm1, %v613_v12, %v2331_v4 }
  0x93   : > { %v556_v10 = vpop.permute.xlu1 %555 }
  0x94   : > { %v552_v11 = vpop.permute.xlu0 %551  ;;  %v622_v18 = vsel %vm610_vm0, %v2191_v38, %v556_v10 }
  0x95   : > { %v616_v13 = vsel %vm610_vm0, %v2178_v15, %v552_v11  ;;  %v643_v30 = vsel %vm635_vm1, %v622_v18, %v2333_v5 }
  0x96   : > { %v639_v17 = vsel %vm635_vm1, %v616_v13, %v2329_v1 }
  0x97   : > { %v597_v16 = vpop.permute.xlu1 %596 }
  0x98   : > { %v656_v19 = vsel %vm652_vm2, %v639_v17, %v597_v16  ;;  %v595_v21 = vpop.permute.xlu0 %594 }
  0x99   : > { %v1810_v23 = vcombine.low %v656_v19, %v656_v19  ;;  %v1811_v24 = vcombine.high %v656_v19, %v656_v19  ;;  %v654_v25 = vsel %vm652_vm2, %v637_v20, %v595_v21 }
  0x9a   : > { %v1808_v8 = vcombine.low %v654_v25, %v654_v25  ;;  %v1809_v26 = vcombine.high %v654_v25, %v654_v25 }
  0x9b   : > { %v727_v28 = vshrl.u32 %v1810_v23, 16  ;;  %v730_v29 = vshll.u32 %v1810_v23, 16  ;;  %v601_v34 = vpop.permute.xlu1 %600  ;;  %v736_v44 = vshll.u32 %v1811_v24, 16 }
  0x9c   : > { %v713_v36 = vshrl.u32 %v1808_v8, 16  ;;  %v716_v37 = vshll.u32 %v1808_v8, 16  ;;  %v660_v39 = vsel %vm652_vm2, %v643_v30, %v601_v34  ;;  %v599_v41 = vpop.permute.xlu0 %598  ;;  %v722_v48 = vshll.u32 %v1809_v26, 16 }
  0x9d   : > { %v729_v42 = vrot.slane %v727_v28, 4  ;;  %v732_v43 = vrot.slane %v730_v29, 5  ;;  %v1814_v45 = vcombine.low %v660_v39, %v660_v39  ;;  %v1815_v49 = vcombine.high %v660_v39, %v660_v39 }
  0x9e   : > { %v715_v46 = vrot.slane %v713_v36, 4  ;;  %v718_v47 = vrot.slane %v716_v37, 5  ;;  %v658_v53 = vsel %vm652_vm2, %v641_v40, %v599_v41  ;;  %v738_v63 = vrot.slane %v736_v44, 5 }
  0x9f   : > { %v733_v33 = vor.u32 %v732_v43, %v729_v42  ;;  %v755_v50 = vshrl.u32 %v1814_v45, 16  ;;  %v758_v51 = vshll.u32 %v1814_v45, 16  ;;  %v1025_v54 = vpop.permute.xlu1 %1024  ;;  %v1812_v58 = vcombine.low %v658_v53, %v658_v53  ;;  %v2068_v42 = vld [vmem:[%s2695_s3 + $0x28] sm:$0xff]  }
  0xa0   : > { %v719_v55 = vor.u32 %v718_v47, %v715_v46  ;;  %v1813_v59 = vcombine.high %v658_v53, %v658_v53  ;;  %v1023_v60 = vpop.permute.xlu0 %1022  ;;  %v764_v0 = vshll.u32 %v1815_v49, 16  ;;  %v724_v10 = vrot.slane %v722_v48, 5 }
  0xa1   : > { %v757_v61 = vrot.slane %v755_v50, 4  ;;  %v760_v62 = vrot.slane %v758_v51, 5  ;;  %v741_v2 = vshrl.u32 %v1812_v58, 16  ;;  %v744_v7 = vshll.u32 %v1812_v58, 16 }
  0xa2   : > { %v720_v13 = vrot.slane %v719_v55, 4  ;;  %v734_v16 = vrot.slane %v733_v33, 4  ;;  %v750_v19 = vshll.u32 %v1813_v59, 16  ;;  %v766_v24 = vrot.slane %v764_v0, 5 }
  0xa3   : > { %v761_v11 = vor.u32 %v760_v62, %v757_v61  ;;  %v1029_v12 = vpop.permute.xlu1 %1028  ;;  %v743_v17 = vrot.slane %v741_v2, 4  ;;  %v746_v18 = vrot.slane %v744_v7, 5  ;;  %v1064_v30 = vsel %vm610_vm0, %v2178_v15, %v1025_v54 }
  0xa4   : > { %v1027_v20 = vpop.permute.xlu0 %1026  ;;  %v725_v22 = vsel %vm2359_vm5, %v720_v13, %v724_v10  ;;  %v2367_v23 = vsel %vm2359_vm5, %v734_v16, %v738_v63  ;;  %v752_v29 = vrot.slane %v750_v19, 5  ;;  %v1062_v37 = vsel %vm610_vm0, %v2164_v3, %v1023_v60 }
  0xa5   : > { %v762_v21 = vrot.slane %v761_v11, 4  ;;  %v747_v25 = vor.u32 %v746_v18, %v743_v17  ;;  %v1824_v8 = vcombine.low %v725_v22, %v2367_v23  ;;  %v1078_v15 = vsel %vm635_vm1, %v1064_v30, %v2329_v1 }
  0xa6   : > { %v1077_v3 = vsel %vm635_vm1, %v1062_v37, %v2331_v4  ;;  %v1066_v62 = vsel %vm610_vm0, %v2176_v14, %v1027_v20 }
  0xa7   : > { %v560_v26 = vpop.permute.xlu1 %559  ;;  %v748_v28 = vrot.slane %v747_v25, 4  ;;  %v2374_v34 = vsel %vm2359_vm5, %v762_v21, %v766_v24  ;;  %1968 = vmatprep.mubr.msk.bf16.mxu0 %vm852_vm6, %v1824_v8  ;;  %v1079_v7 = vsel %vm635_vm1, %v1066_v62, %v2335_v6 }
  0xa8   : > { %v558_v36 = vpop.permute.xlu0 %557  ;;  %v628_v6 = vsel %vm610_vm0, %v2270_v32, %v560_v26 }
  0xa9   : > { %v2381_v39 = vsel %vm2359_vm5, %v748_v28, %v752_v29  ;;  %v625_v24 = vsel %vm610_vm0, %v2252_v27, %v558_v36  ;;  %v2069_v29 = vld [vmem:[%s2695_s3 + $0x38] sm:$0xff]  }
  0xaa   : > { %v1825_v40 = vcombine.low %v2381_v39, %v2374_v34 }
  0xab   : > { %v1048_v41 = vpop.permute.xlu1 %1047 }
  0xac   : > { %v1088_v43 = vsel %vm652_vm2, %v1078_v15, %v1048_v41  ;;  %v1046_v44 = vpop.permute.xlu0 %1045  ;;  %1969 = vmatmul.mubr.msk.bf16.vlgmr.msra.gmra.mrb[0].mxu0 %vm852_vm6, %v1825_v40 }
  0xad   : > { %v1838_v45 = vcombine.low %v1088_v43, %v1088_v43  ;;  %v1839_v46 = vcombine.high %v1088_v43, %v1088_v43  ;;  %v1086_v47 = vsel %vm652_vm2, %v1077_v3, %v1046_v44  ;;  %1989 = vmatpush3.bf16.msra.mxu0 %v2301_v52  ;;  %v1068_v52 = vsel %vm610_vm0, %v2191_v38, %v1029_v12 }
  0xae   : > { %v1836_v1 = vcombine.low %v1086_v47, %v1086_v47  ;;  %v1837_v48 = vcombine.high %v1086_v47, %v1086_v47  ;;  %1990 = vmatprep.subr.bf16.mxu0 %v2068_v42  ;;  %v1080_v63 = vsel %vm635_vm1, %v1068_v52, %v2333_v5 }
  0xaf   : > { %v1853_v33 = vrot.slane %v1838_v45, 9  ;;  %v1150_v50 = vrot.slane %v1839_v46, 5  ;;  %v564_v51 = vpop.permute.xlu1 %563 }
  0xb0   : > { %v1852_v4 = vrot.slane %v1836_v1, 9  ;;  %v1146_v53 = vrot.slane %v1837_v48, 5  ;;  %v562_v54 = vpop.permute.xlu0 %561  ;;  %v634_v41 = vsel %vm610_vm0, %v2274_v35, %v564_v51 }
  0xb1   : > { %v2402_v55 = vsel %vm2395_vm9, %v1853_v33, %v1150_v50  ;;  %1991 = vmatpush3.bf16.msra.mxu0 %v2068_v42  ;;  %v631_v3 = vsel %vm610_vm0, %v2266_v31, %v562_v54 }
  0xb2   : > { %v1147_v58 = vsel %vm2395_vm9, %v1852_v4, %v1146_v53 }
  0xb3   : > { %v2406_v59 = vpop.permute.xlu1 %580  ;;  %v1864_v60 = vcombine.low %v1147_v58, %v2402_v55 }
  0xb4   : > { %v2411_v61 = vpop.permute.xlu0 %578  ;;  %v647_v25 = vsel %vm635_vm1, %v628_v6, %v2406_v59 }
  0xb5   : > { %1980 = vmatprep.mubr.msk.bf16.mxu1 %vm852_vm6, %v1864_v60  ;;  %v645_v26 = vsel %vm635_vm1, %v625_v24, %v2411_v61 }
  0xb7   : > { %v1052_v0 = vpop.permute.xlu1 %1051 }
  0xb8   : > { %v1092_v2 = vsel %vm652_vm2, %v1080_v63, %v1052_v0  ;;  %v1050_v10 = vpop.permute.xlu0 %1049 }
  0xb9   : > { %v1842_v11 = vcombine.low %v1092_v2, %v1092_v2  ;;  %v1843_v13 = vcombine.high %v1092_v2, %v1092_v2  ;;  %v1090_v38 = vsel %vm652_vm2, %v1079_v7, %v1050_v10 }
  0xba   : > { %v1840_v12 = vcombine.low %v1090_v38, %v1090_v38  ;;  %v1841_v16 = vcombine.high %v1090_v38, %v1090_v38 }
  0xbb   : > { %v1855_v17 = vrot.slane %v1842_v11, 9  ;;  %v1158_v14 = vrot.slane %v1843_v13, 5  ;;  %v2422_v18 = vpop.permute.xlu1 %584 }
  0xbc   : > { %v1854_v19 = vrot.slane %v1840_v12, 9  ;;  %v1154_v20 = vrot.slane %v1841_v16, 5  ;;  %v2424_v5 = vpop.permute.xlu0 %582  ;;  %v651_v44 = vsel %vm635_vm1, %v634_v41, %v2422_v18 }
  0xbd   : > { %v2428_v21 = vsel %vm2395_vm9, %v1855_v17, %v1158_v14  ;;  %v649_v54 = vsel %vm635_vm1, %v631_v3, %v2424_v5 }
  0xbe   : > { %v2434_v22 = vsel %vm2395_vm9, %v1854_v19, %v1154_v20 }
  0xbf   : > { %v605_v8 = vpop.permute.xlu1 %604  ;;  %v1865_v28 = vcombine.low %v2434_v22, %v2428_v21 }
  0xc0   : > { %v664_v30 = vsel %vm652_vm2, %v647_v25, %v605_v8  ;;  %v603_v37 = vpop.permute.xlu0 %602 }
  0xc1   : > { %v1818_v40 = vcombine.low %v664_v30, %v664_v30  ;;  %v1819_v15 = vcombine.high %v664_v30, %v664_v30  ;;  %v662_v36 = vsel %vm652_vm2, %v645_v26, %v603_v37  ;;  %1981 = vmatmul.mubr.msk.bf16.vlgmr.msra.gmra.mrb[0].mxu1 %vm852_vm6, %v1865_v28 }
  0xc2   : > { %v1816_v42 = vcombine.low %v662_v36, %v662_v36  ;;  %v1817_v43 = vcombine.high %v662_v36, %v662_v36  ;;  %2001 = vmatpush3.bf16.msra.mxu1 %v2308_v56 }
  0xc3   : > { %v783_v45 = vshrl.u32 %v1818_v40, 16  ;;  %v786_v46 = vshll.u32 %v1818_v40, 16  ;;  %v609_v47 = vpop.permute.xlu1 %608  ;;  %2002 = vmatprep.subr.bf16.mxu1 %v2069_v29  ;;  %v792_v1 = vshll.u32 %v1819_v15, 16 }
  0xc4   : > { %v769_v48 = vshrl.u32 %v1816_v42, 16  ;;  %v772_v33 = vshll.u32 %v1816_v42, 16  ;;  %v668_v50 = vsel %vm652_vm2, %v651_v44, %v609_v47  ;;  %v607_v51 = vpop.permute.xlu0 %606  ;;  %v778_v58 = vshll.u32 %v1817_v43, 16 }
  0xc5   : > { %v785_v4 = vrot.slane %v783_v45, 4  ;;  %v788_v53 = vrot.slane %v786_v46, 5  ;;  %v1822_v56 = vcombine.low %v668_v50, %v668_v50  ;;  %v1823_v62 = vcombine.high %v668_v50, %v668_v50 }
  0xc6   : > { %v771_v60 = vrot.slane %v769_v48, 4  ;;  %v774_v52 = vrot.slane %v772_v33, 5  ;;  %2003 = vmatpush3.bf16.msra.mxu1 %v2069_v29  ;;  %v666_v7 = vsel %vm652_vm2, %v649_v54, %v607_v51  ;;  %v794_v11 = vrot.slane %v792_v1, 5 }
  0xc7   : > { %v789_v63 = vor.u32 %v788_v53, %v785_v4  ;;  %v811_v0 = vshrl.u32 %v1822_v56, 16  ;;  %v814_v2 = vshll.u32 %v1822_v56, 16  ;;  %v1033_v10 = vpop.permute.xlu1 %1032  ;;  %v1820_v38 = vcombine.low %v666_v7, %v666_v7 }
  0xc8   : > { %v775_v13 = vor.u32 %v774_v52, %v771_v60  ;;  %v1821_v12 = vcombine.high %v666_v7, %v666_v7  ;;  %v1031_v16 = vpop.permute.xlu0 %1030  ;;  %v780_v14 = vrot.slane %v778_v58, 5  ;;  %v820_v24 = vshll.u32 %v1823_v62, 16 }
  0xc9   : > { %v790_v17 = vrot.slane %v789_v63, 4  ;;  %v813_v19 = vrot.slane %v811_v0, 4  ;;  %v816_v20 = vrot.slane %v814_v2, 5  ;;  %v797_v25 = vshrl.u32 %v1820_v38, 16 }
  0xca   : > { %v776_v6 = vrot.slane %v775_v13, 4  ;;  %v800_v8 = vshll.u32 %v1820_v38, 16  ;;  %v806_v26 = vshll.u32 %v1821_v12, 16  ;;  %v1072_v36 = vsel %vm610_vm0, %v2270_v32, %v1033_v10 }
  0xcb   : > { %v2463_v28 = vsel %vm2359_vm5, %v790_v17, %v794_v11  ;;  %v817_v29 = vor.u32 %v816_v20, %v813_v19  ;;  %v1037_v30 = vpop.permute.xlu1 %1036  ;;  %v799_v40 = vrot.slane %v797_v25, 4  ;;  %v1070_v43 = vsel %vm610_vm0, %v2252_v27, %v1031_v16 }
  0xcc   : > { %v2467_v37 = vsel %vm2359_vm5, %v776_v6, %v780_v14  ;;  %v802_v15 = vrot.slane %v800_v8, 5  ;;  %v1035_v41 = vpop.permute.xlu0 %1034  ;;  %v822_v3 = vrot.slane %v820_v24, 5  ;;  %v808_v46 = vrot.slane %v806_v26, 5 }
  0xcd   : > { %v818_v42 = vrot.slane %v817_v29, 4  ;;  %v1826_v45 = vcombine.low %v2467_v37, %v2463_v28  ;;  %v1076_v47 = vsel %vm610_vm0, %v2274_v35, %v1037_v30  ;;  %v1082_v1 = vsel %vm635_vm1, %v1072_v36, %v2406_v59 }
  0xce   : > { %v803_v44 = vor.u32 %v802_v15, %v799_v40  ;;  %v1081_v50 = vsel %vm635_vm1, %v1070_v43, %v2411_v61  ;;  %v1074_v35 = vsel %vm610_vm0, %v2266_v31, %v1035_v41  ;;  %v1890_v58 = vcombine.low %v2367_v23, %v2381_v39 }
  0xcf   : > { %v1056_v48 = vpop.permute.xlu1 %1055  ;;  %v2481_v32 = vsel %vm2359_vm5, %v818_v42, %v822_v3  ;;  %1972 = vmatprep.mubr.msk.bf16.mxu0 %vm852_vm6, %v1826_v45  ;;  %v1084_v63 = vsel %vm635_vm1, %v1076_v47, %v2422_v18  ;;  %v1083_v23 = vsel %vm635_vm1, %v1074_v35, %v2424_v5  ;;  %v1891_v30 = vcombine.low %v2374_v34, %v2467_v37 }
  0xd0   : > { %v804_v33 = vrot.slane %v803_v44, 4  ;;  %v1096_v27 = vsel %vm652_vm2, %v1082_v1, %v1056_v48  ;;  %v1054_v51 = vpop.permute.xlu0 %1053  ;;  %v1915_v42 = vcombine.low %v2402_v55, %v2434_v22 }
  0xd1   : > { %v1846_v4 = vcombine.low %v1096_v27, %v1096_v27  ;;  %v1847_v53 = vcombine.high %v1096_v27, %v1096_v27  ;;  %v1094_v59 = vsel %vm652_vm2, %v1081_v50, %v1054_v51 }
  0xd2   : > { %v809_v56 = vsel %vm2359_vm5, %v804_v33, %v808_v46  ;;  %v1844_v54 = vcombine.low %v1094_v59, %v1094_v59  ;;  %v1845_v60 = vcombine.high %v1094_v59, %v1094_v59 }
  0xd3   : > { %v1857_v52 = vrot.slane %v1846_v4, 9  ;;  %v1166_v62 = vrot.slane %v1847_v53, 5  ;;  %v1827_v61 = vcombine.low %v809_v56, %v2481_v32  ;;  %v1060_v31 = vpop.permute.xlu1 %1059  ;;  %v1892_v36 = vcombine.low %v2463_v28, %v809_v56 }
  0xd4   : > { %v1856_v0 = vrot.slane %v1844_v54, 9  ;;  %v1162_v2 = vrot.slane %v1845_v60, 5  ;;  %v1100_v7 = vsel %vm652_vm2, %v1084_v63, %v1060_v31  ;;  %v1058_v39 = vpop.permute.xlu0 %1057  ;;  %v2542_v54 = vld [vmem:[%s2696_s4] ss:$0 sm:$0xff] }
  0xd5   : > { %v1167_v10 = vsel %vm2395_vm9, %v1857_v52, %v1166_v62  ;;  %1973 = vmatmul.mubr.msk.bf16.gmra.mrb[4].mxu0 %vm852_vm6, %v1827_v61  ;;  %v1850_v11 = vcombine.low %v1100_v7, %v1100_v7  ;;  %v1851_v13 = vcombine.high %v1100_v7, %v1100_v7  ;;  %v1098_v38 = vsel %vm652_vm2, %v1083_v23, %v1058_v39 }
  0xd6   : > { %v1163_v18 = vsel %vm2395_vm9, %v1856_v0, %v1162_v2  ;;  %1992 = vmatprep.mubr.msk.bf16.mxu0 %vm852_vm6, %v1890_v58  ;;  %v1848_v12 = vcombine.low %v1098_v38, %v1098_v38  ;;  %v1849_v16 = vcombine.high %v1098_v38, %v1098_v38 }
  0xd7   : > { %v1859_v17 = vrot.slane %v1850_v11, 9  ;;  %v1174_v14 = vrot.slane %v1851_v13, 5  ;;  %v1331_v5 = vpop.permute.xlu1 %1330  ;;  %v1866_v19 = vcombine.low %v1163_v18, %v1167_v10  ;;  %v1916_v48 = vcombine.low %v2428_v21, %v1163_v18 }
  0xd8   : > { %v1858_v20 = vrot.slane %v1848_v12, 9  ;;  %v1170_v6 = vrot.slane %v1849_v16, 5  ;;  %v1329_v24 = vpop.permute.xlu0 %1328 }
  0xd9   : > { %v1175_v25 = vsel %vm2395_vm9, %v1859_v17, %v1174_v14  ;;  %v1336_v8 = vsel %vm610_vm0, %v2311_v57, %v1329_v24  ;;  %1984 = vmatprep.mubr.msk.bf16.mxu1 %vm852_vm6, %v1866_v19 }
  0xda   : > { %v1171_v29 = vsel %vm2395_vm9, %v1858_v20, %v1170_v6  ;;  %v1338_v26 = vsel %vm635_vm1, %v1336_v8, %v1331_v5 }
  0xdb   : > { %v1499_v40 = vpop.permute.xlu1 %1498  ;;  %v1867_v15 = vcombine.low %v1171_v29, %v1175_v25  ;;  %v1917_v51 = vcombine.low %v1167_v10, %v1171_v29 }
  0xdc   : > { %v1333_v41 = vpop.permute.xlu0 %1332  ;;  %v1503_v43 = vsel %vm610_vm0, %v2311_v57, %v1499_v40 }
  0xdd   : > { %1993 = vmatmul.mubr.msk.bf16.vlgmr.msra.gmra.mrb[8].mxu0 %vm852_vm6, %v1891_v30  ;;  %v1340_v3 = vsel %vm652_vm2, %v1338_v26, %v1333_v41  ;;  %1985 = vmatmul.mubr.msk.bf16.gmra.mrb[4].mxu1 %vm852_vm6, %v1867_v15  ;;  %v1504_v45 = vsel %vm635_vm1, %v1503_v43, %v1331_v5 }
  0xde   : > { %1996 = vmatprep.mubr.msk.bf16.mxu0 %vm852_vm6, %v1892_v36  ;;  %v1884_v34 = vcombine.low %v1340_v3, %v1340_v3  ;;  %v1885_v37 = vcombine.high %v1340_v3, %v1340_v3  ;;  %2004 = vmatprep.mubr.msk.bf16.mxu1 %vm852_vm6, %v1915_v42 }
  0xe0   : > { %v1347_v28 = vshrl.u32 %v1884_v34, 16  ;;  %v1350_v44 = vshll.u32 %v1884_v34, 16  ;;  %v1501_v55 = vpop.permute.xlu0 %1500  ;;  %v1356_v57 = vshll.u32 %v1885_v37, 16 }
  0xe1   : > { %v1506_v22 = vsel %vm652_vm2, %v1504_v45, %v1501_v55 }
  0xe2   : > { %v1349_v46 = vrot.slane %v1347_v28, 4  ;;  %v1352_v47 = vrot.slane %v1350_v44, 5  ;;  %v1908_v1 = vcombine.low %v1506_v22, %v1506_v22  ;;  %v1909_v33 = vcombine.high %v1506_v22, %v1506_v22 }
  0xe3   : > { %v1358_v53 = vrot.slane %v1356_v57, 5 }
  0xe4   : > { %v1353_v27 = vor.u32 %v1352_v47, %v1349_v46  ;;  %v1910_v50 = vrot.slane %v1908_v1, 9  ;;  %v1514_v35 = vrot.slane %v1909_v33, 5 }
  0xe5   : > { %2005 = vmatmul.mubr.msk.bf16.vlgmr.msra.gmra.mrb[8].mxu1 %vm852_vm6, %v1916_v48 }
  0xe6   : > { %v1354_v4 = vrot.slane %v1353_v27, 4  ;;  %2008 = vmatprep.mubr.msk.bf16.mxu1 %vm852_vm6, %v1917_v51  ;;  %v1515_v58 = vsel %vm2395_vm9, %v1910_v50, %v1514_v35 }
  0xe7   : > { %v1918_v56 = vcombine.low %v1175_v25, %v1515_v58 }
  0xe8   : > { %v1359_v59 = vsel %vm2359_vm5, %v1354_v4, %v1358_v53 }
  0xe9   : > { %v1893_v21 = vcombine.low %v2481_v32, %v1359_v59 }
  0xeb   : > { %1997 = vmatmul.mubr.msk.bf16.gmra.mrb[12].mxu0 %vm852_vm6, %v1893_v21 }
  0xed   : > { %2009 = vmatmul.mubr.msk.bf16.gmra.mrb[12].mxu1 %vm852_vm6, %v1918_v56 }
 0x17f   : > { %v1970_v60 = vpop.f32.mrb[0].mxu0 }
 0x180   : > { %v938_v49 = vmul.f32 %v1970_v60, %v2542_v54  ;;  %v899_v32 = vpop.f32.mrb[1].mxu0 }
 0x181   : > { %v936_v52 = vmul.f32 %v2542_v54, %v899_v32  ;;  %v1971_v62 = vpop.f32.mrb[2].mxu0 }
 0x182   : > { %v952_v61 = vadd.f32 %v2547_v9, %v938_v49  ;;  %v939_v63 = vmul.f32 %v1971_v62, %v2542_v54  ;;  %v902_v31 = vpop.f32.mrb[3].mxu0 }
 0x183   : > { %v950_v0 = vadd.f32 %v2547_v9, %v936_v52  ;;  %v937_v2 = vmul.f32 %v2542_v54, %v902_v31 }
 0x184   : > { %v960_v7 = vmax.f32 %v952_v61, 0.0  ;;  %v953_v23 = vadd.f32 %v2547_v9, %v939_v63 }
 0x185   : > { %v958_v39 = vmax.f32 %v950_v0, 0.0  ;;  %v951_v10 = vadd.f32 %v2547_v9, %v937_v2 }
 0x186   : > { %968 = vst.msk [vmem:[%s2557_s19 + $0x10] sm:$0xff] %vm635_vm1, %v960_v7  ;;  %v961_v11 = vmax.f32 %v953_v23, 0.0 }
 0x187   : > { %966 = vst.msk [vmem:[%s2557_s19] sm:$0xff] %vm635_vm1, %v958_v39  ;;  %v959_v13 = vmax.f32 %v951_v10, 0.0 }
 0x188   : > { %969 = vst.msk [vmem:[%s2557_s19 + $0x18] sm:$0xff] %vm635_vm1, %v961_v11 }
 0x189   : > { %967 = vst.msk [vmem:[%s2557_s19 + $0x8] sm:$0xff] %vm635_vm1, %v959_v13 }
 0x194   : > { %v1982_v38 = vpop.f32.mrb[0].mxu1 }
 0x195   : > { %v1284_v18 = vmul.f32 %v1982_v38, %v2542_v54  ;;  %v1251_v12 = vpop.f32.mrb[1].mxu1 }
 0x196   : > { %v1282_v16 = vmul.f32 %v2542_v54, %v1251_v12  ;;  %v1983_v17 = vpop.f32.mrb[2].mxu1 }
 0x197   : > { %v1292_v14 = vadd.f32 %v2547_v9, %v1284_v18  ;;  %v1285_v5 = vmul.f32 %v1983_v17, %v2542_v54  ;;  %v1254_v19 = vpop.f32.mrb[3].mxu1 }
 0x198   : > { %v1290_v20 = vadd.f32 %v2547_v9, %v1282_v16  ;;  %v1283_v6 = vmul.f32 %v2542_v54, %v1254_v19 }
 0x199   : > { %v1300_v24 = vmax.f32 %v1292_v14, 0.0  ;;  %v1293_v25 = vadd.f32 %v2547_v9, %v1285_v5 }
 0x19a   : > { %v1298_v8 = vmax.f32 %v1290_v20, 0.0  ;;  %v1291_v29 = vadd.f32 %v2547_v9, %v1283_v6 }
 0x19b   : > { %1876 = vst.msk [vmem:[%s2557_s19 + $0x50] sm:$0xff] %vm635_vm1, %v1300_v24  ;;  %v1301_v26 = vmax.f32 %v1293_v25, 0.0 }
 0x19c   : > { %1874 = vst.msk [vmem:[%s2557_s19 + $0x40] sm:$0xff] %vm635_vm1, %v1298_v8  ;;  %v1299_v30 = vmax.f32 %v1291_v29, 0.0 }
 0x19d   : > { %1877 = vst.msk [vmem:[%s2557_s19 + $0x58] sm:$0xff] %vm635_vm1, %v1301_v26 }
 0x19e   : > { %1875 = vst.msk [vmem:[%s2557_s19 + $0x48] sm:$0xff] %vm635_vm1, %v1299_v30 }
 0x1a8   : > { %v1974_v40 = vpop.f32.mrb[4].mxu0 }
 0x1a9   : > { %v942_v15 = vmul.f32 %v1974_v40, %v2542_v54  ;;  %v915_v36 = vpop.f32.mrb[5].mxu0 }
 0x1aa   : > { %v940_v41 = vmul.f32 %v2542_v54, %v915_v36  ;;  %v1975_v42 = vpop.f32.mrb[6].mxu0 }
 0x1ab   : > { %v956_v43 = vadd.f32 %v2547_v9, %v942_v15  ;;  %v943_v3 = vmul.f32 %v1975_v42, %v2542_v54  ;;  %v918_v34 = vpop.f32.mrb[7].mxu0 }
 0x1ac   : > { %v954_v37 = vadd.f32 %v2547_v9, %v940_v41  ;;  %v941_v28 = vmul.f32 %v2542_v54, %v918_v34 }
 0x1ad   : > { %v964_v44 = vmax.f32 %v956_v43, 0.0  ;;  %v957_v45 = vadd.f32 %v2547_v9, %v943_v3 }
 0x1ae   : > { %v962_v55 = vmax.f32 %v954_v37, 0.0  ;;  %v955_v22 = vadd.f32 %v2547_v9, %v941_v28 }
 0x1af   : > { %972 = vst.msk [vmem:[%s2557_s19 + $0x30] sm:$0xff] %vm635_vm1, %v964_v44  ;;  %v965_v46 = vmax.f32 %v957_v45, 0.0 }
 0x1b0   : > { %970 = vst.msk [vmem:[%s2557_s19 + $0x20] sm:$0xff] %vm635_vm1, %v962_v55  ;;  %v963_v47 = vmax.f32 %v955_v22, 0.0  ;;  %v1994_v57 = vpop.f32.mrb[8].mxu0  ;;  %v1986_v1 = vpop.f32.mrb[4].mxu1 }
 0x1b1   : > { %973 = vst.msk [vmem:[%s2557_s19 + $0x38] sm:$0xff] %vm635_vm1, %v965_v46  ;;  %v1461_v48 = vmul.f32 %v1994_v57, %v2542_v54  ;;  %v1428_v33 = vpop.f32.mrb[9].mxu0  ;;  %v1288_v27 = vmul.f32 %v1986_v1, %v2542_v54  ;;  %v1267_v50 = vpop.f32.mrb[5].mxu1 }
 0x1b2   : > { %971 = vst.msk [vmem:[%s2557_s19 + $0x28] sm:$0xff] %vm635_vm1, %v963_v47  ;;  %v1459_v51 = vmul.f32 %v2542_v54, %v1428_v33  ;;  %v1995_v35 = vpop.f32.mrb[10].mxu0  ;;  %v1286_v4 = vmul.f32 %v2542_v54, %v1267_v50  ;;  %v1987_v53 = vpop.f32.mrb[6].mxu1 }
 0x1b3   : > { %v1469_v59 = vadd.f32 %v2547_v9, %v1461_v48  ;;  %v1296_v58 = vadd.f32 %v2547_v9, %v1288_v27  ;;  %v1462_v21 = vmul.f32 %v1995_v35, %v2542_v54  ;;  %v1431_v56 = vpop.f32.mrb[11].mxu0  ;;  %v1289_v60 = vmul.f32 %v1987_v53, %v2542_v54  ;;  %v1270_v49 = vpop.f32.mrb[7].mxu1 }
 0x1b4   : > { %v1467_v32 = vadd.f32 %v2547_v9, %v1459_v51  ;;  %v1294_v52 = vadd.f32 %v2547_v9, %v1286_v4  ;;  %v1460_v62 = vmul.f32 %v2542_v54, %v1431_v56  ;;  %v1287_v61 = vmul.f32 %v2542_v54, %v1270_v49 }
 0x1b5   : > { %v1477_v63 = vmax.f32 %v1469_v59, 0.0  ;;  %v1304_v31 = vmax.f32 %v1296_v58, 0.0  ;;  %v1470_v0 = vadd.f32 %v2547_v9, %v1462_v21  ;;  %v1297_v2 = vadd.f32 %v2547_v9, %v1289_v60 }
 0x1b6   : > { %v1475_v7 = vmax.f32 %v1467_v32, 0.0  ;;  %v1302_v23 = vmax.f32 %v1294_v52, 0.0  ;;  %v1468_v39 = vadd.f32 %v2547_v9, %v1460_v62  ;;  %v1295_v10 = vadd.f32 %v2547_v9, %v1287_v61 }
 0x1b7   : > { %1902 = vst.msk [vmem:[%s2557_s19 + $0x90] sm:$0xff] %vm635_vm1, %v1477_v63  ;;  %1880 = vst.msk [vmem:[%s2557_s19 + $0x70] sm:$0xff] %vm635_vm1, %v1304_v31  ;;  %v1478_v11 = vmax.f32 %v1470_v0, 0.0  ;;  %v1305_v13 = vmax.f32 %v1297_v2, 0.0 }
 0x1b8   : > { %1900 = vst.msk [vmem:[%s2557_s19 + $0x80] sm:$0xff] %vm635_vm1, %v1475_v7  ;;  %1878 = vst.msk [vmem:[%s2557_s19 + $0x60] sm:$0xff] %vm635_vm1, %v1302_v23  ;;  %v1476_v38 = vmax.f32 %v1468_v39, 0.0  ;;  %v1303_v18 = vmax.f32 %v1295_v10, 0.0  ;;  %v2006_v12 = vpop.f32.mrb[8].mxu1 }
 0x1b9   : > { %1903 = vst.msk [vmem:[%s2557_s19 + $0x98] sm:$0xff] %vm635_vm1, %v1478_v11  ;;  %1881 = vst.msk [vmem:[%s2557_s19 + $0x78] sm:$0xff] %vm635_vm1, %v1305_v13  ;;  %v1617_v16 = vmul.f32 %v2006_v12, %v2542_v54  ;;  %v1584_v17 = vpop.f32.mrb[9].mxu1 }
 0x1ba   : > { %1901 = vst.msk [vmem:[%s2557_s19 + $0x88] sm:$0xff] %vm635_vm1, %v1476_v38  ;;  %1879 = vst.msk [vmem:[%s2557_s19 + $0x68] sm:$0xff] %vm635_vm1, %v1303_v18  ;;  %v1615_v14 = vmul.f32 %v2542_v54, %v1584_v17  ;;  %v2007_v5 = vpop.f32.mrb[10].mxu1 }
 0x1bb   : > { %v1625_v19 = vadd.f32 %v2547_v9, %v1617_v16  ;;  %v1618_v20 = vmul.f32 %v2007_v5, %v2542_v54  ;;  %v1587_v6 = vpop.f32.mrb[11].mxu1 }
 0x1bc   : > { %v1623_v24 = vadd.f32 %v2547_v9, %v1615_v14  ;;  %v1616_v25 = vmul.f32 %v2542_v54, %v1587_v6 }
 0x1bd   : > { %v1633_v8 = vmax.f32 %v1625_v19, 0.0  ;;  %v1626_v29 = vadd.f32 %v2547_v9, %v1618_v20 }
 0x1be   : > { %v1631_v26 = vmax.f32 %v1623_v24, 0.0  ;;  %v1624_v30 = vadd.f32 %v2547_v9, %v1616_v25  ;;  %v1998_v40 = vpop.f32.mrb[12].mxu0 }
 0x1bf   : > { %1927 = vst.msk [vmem:[%s2557_s19 + $0xd0] sm:$0xff] %vm635_vm1, %v1633_v8  ;;  %v1634_v15 = vmax.f32 %v1626_v29, 0.0  ;;  %v1465_v36 = vmul.f32 %v1998_v40, %v2542_v54  ;;  %v1444_v41 = vpop.f32.mrb[13].mxu0 }
 0x1c0   : > { %1925 = vst.msk [vmem:[%s2557_s19 + $0xc0] sm:$0xff] %vm635_vm1, %v1631_v26  ;;  %v1632_v42 = vmax.f32 %v1624_v30, 0.0  ;;  %v1463_v43 = vmul.f32 %v2542_v54, %v1444_v41  ;;  %v1999_v3 = vpop.f32.mrb[14].mxu0  ;;  %v2010_v34 = vpop.f32.mrb[12].mxu1 }
 0x1c1   : > { %1928 = vst.msk [vmem:[%s2557_s19 + $0xd8] sm:$0xff] %vm635_vm1, %v1634_v15  ;;  %v1473_v37 = vadd.f32 %v2547_v9, %v1465_v36  ;;  %v1466_v28 = vmul.f32 %v1999_v3, %v2542_v54  ;;  %v1621_v44 = vmul.f32 %v2010_v34, %v2542_v54  ;;  %v1447_v45 = vpop.f32.mrb[15].mxu0  ;;  %v1600_v55 = vpop.f32.mrb[13].mxu1 }
 0x1c2   : > { %1926 = vst.msk [vmem:[%s2557_s19 + $0xc8] sm:$0xff] %vm635_vm1, %v1632_v42  ;;  %v1471_v22 = vadd.f32 %v2547_v9, %v1463_v43  ;;  %v1464_v46 = vmul.f32 %v2542_v54, %v1447_v45  ;;  %v1619_v47 = vmul.f32 %v2542_v54, %v1600_v55  ;;  %v2011_v57 = vpop.f32.mrb[14].mxu1 }
 0x1c3   : > { %v1481_v1 = vmax.f32 %v1473_v37, 0.0  ;;  %v1474_v48 = vadd.f32 %v2547_v9, %v1466_v28  ;;  %v1629_v33 = vadd.f32 %v2547_v9, %v1621_v44  ;;  %v1622_v27 = vmul.f32 %v2011_v57, %v2542_v54  ;;  %v1603_v50 = vpop.f32.mrb[15].mxu1 }
 0x1c4   : > { %v1479_v51 = vmax.f32 %v1471_v22, 0.0  ;;  %v1472_v35 = vadd.f32 %v2547_v9, %v1464_v46  ;;  %v1627_v4 = vadd.f32 %v2547_v9, %v1619_v47  ;;  %v1620_v53 = vmul.f32 %v2542_v54, %v1603_v50 }
 0x1c5   : > { %1906 = vst.msk [vmem:[%s2557_s19 + $0xb0] sm:$0xff] %vm635_vm1, %v1481_v1  ;;  %v1482_v59 = vmax.f32 %v1474_v48, 0.0  ;;  %v1637_v58 = vmax.f32 %v1629_v33, 0.0  ;;  %v1630_v21 = vadd.f32 %v2547_v9, %v1622_v27 }
 0x1c6   : > { %1904 = vst.msk [vmem:[%s2557_s19 + $0xa0] sm:$0xff] %vm635_vm1, %v1479_v51  ;;  %v1480_v56 = vmax.f32 %v1472_v35, 0.0  ;;  %v1635_v60 = vmax.f32 %v1627_v4, 0.0  ;;  %v1628_v49 = vadd.f32 %v2547_v9, %v1620_v53 }
 0x1c7   : > { %1907 = vst.msk [vmem:[%s2557_s19 + $0xb8] sm:$0xff] %vm635_vm1, %v1482_v59  ;;  %1931 = vst.msk [vmem:[%s2557_s19 + $0xf0] sm:$0xff] %vm635_vm1, %v1637_v58  ;;  %v1638_v32 = vmax.f32 %v1630_v21, 0.0 }
 0x1c8   : > { %1905 = vst.msk [vmem:[%s2557_s19 + $0xa8] sm:$0xff] %vm635_vm1, %v1480_v56  ;;  %1929 = vst.msk [vmem:[%s2557_s19 + $0xe0] sm:$0xff] %vm635_vm1, %v1635_v60  ;;  %v1636_v54 = vmax.f32 %v1628_v49, 0.0 }
 0x1c9   : > { %1932 = vst.msk [vmem:[%s2557_s19 + $0xf8] sm:$0xff] %vm635_vm1, %v1638_v32 }
 0x1ca   : > { %1930 = vst.msk [vmem:[%s2557_s19 + $0xe8] sm:$0xff] %vm635_vm1, %v1636_v54 }
 0x1cb PF: > { %s16_s23 = sadd.s32 1, %s2092_s23   ;;  %s2703_s21 = smov %s2088_s22 }
 0x1cc   : > { %p13_p5 = scmp.ge.s32.totalorder %s16_s23, 4   ;;  %s2704_s22 = smov %s2706_s24 }
 0x1ce   :  { %15 = sbr.rel (!%p13_p5) target bundleno = 2 (0x2), region = 86 }

// kernel: unet_up_forward.2
= control target key start
LH: loop header
LB: loop body
LE: loop exit
PB: predicated region body
PF: predicated region fallthrough
CT: control target
= control target key end

     0   :  { %s2092_s15 = smov 0   ;;  %s2094_s16 = smov 0   ;;  %s2596_s0 = inlined_call_operand.vmem [shape: bf16[2,10,10,8], index: 0, kind: input, shape index: {}, may-alias: {0,1,2}]   ;;  %s2597_s1 = inlined_call_operand.vmem [shape: bf16[2,10,10,8], index: 1, kind: input, shape index: {}, may-alias: {0,1,2}]   ;;  %s2598_s2 = inlined_call_operand.vmem [shape: bf16[2,10,10,8], index: 2, kind: input, shape index: {}, may-alias: {0,1,2}]   ;;  %s2599_s3 = inlined_call_operand.vmem [shape: bf16[2,2,32,16], index: 3, kind: input, shape index: {}]   ;;  %s2600_s4 = inlined_call_operand.vmem [shape: f32[2,1,2,16], index: 4, kind: output, shape index: {}]  }
   0x1   :  { %s2096_s17 = smov 0  }
   0x2 LB: > { %s26_s18 = sadd.s32 1, %s2058_s16  ;;  %p1782_p0 = scmp.ge.s32.totalorder %s2062_s17, 1  ;;  %s2062_s17 = sphi %s2096_s17, %s14_s17   ;;  %s2058_s16 = sphi %s2094_s16, %s2606_s16   ;;  %s2054_s15 = sphi %s2092_s15, %s2605_s15  }
   0x3   : > { %p28_p1 = scmp.ge.s32.totalorder %s26_s18, 2  ;;  %p246_p2 = scmp.lt.s32.totalorder %s2062_s17, 3 }
   0x5   : > { %s2608_s18 = smov (%p28_p1, %s26_s18), 0  ;;  %p247_p3 = pnand %p1782_p0, %p246_p2 }
   0x6   : > { %p313_p4 = scmp.lt.s32.totalorder (!%p247_p3), %s2054_s15, 1  ;;  %s2064_s23 = smov (!%p247_p3), 16   ;;  %v2032_v46 = vld [vmem:[%s2599_s3] sm:$0xff] (!%p247_p3)   ;;  %v2033_v55 = vld [vmem:[%s2599_s3 + $0x8] sm:$0xff] (!%p247_p3)   ;;  %vm549_vm0 = vcmask (!%p247_p3), 64512   ;;  %vm574_vm1 = vcmask (!%p247_p3), 130048  }
   0x7   : > { %250 = sbr.rel (%p247_p3) target bundleno = 481 (0x1e1), region = 36  ;;  %s2065_s25 = smov (!%p247_p3), 8   ;;  %1934 = vmatprep.subr.bf16.mxu0 (!%p247_p3), %v2032_v46  ;;  %vm591_vm2 = vcmask (!%p247_p3), 195584   ;;  %vm648_vm3 = vsmask.f32 (!%p247_p3), 3328  ;;  %vm791_vm6 = vcmask (!%p247_p3), 261120  }
   0x8   : > { %s2066_s5 = smov (!%p247_p3), 24   ;;  %1935 = vmatpush3.bf16.msra.mxu0 (!%p247_p3), %v2032_v46  ;;  %vm649_vm4 = vsmask.f32 (!%p247_p3), 7440  ;;  %vm1088_vm7 = vcmask (!%p247_p3), 1042432   ;;  %vm1089_vm8 = vcmask (!%p247_p3), 1046532   ;;  %vm1652_vm10 = vcmask (!%p247_p3), 1040384  }
   0x9   : > { %1936 = vmatprep.subr.bf16.mxu0 (!%p247_p3), %v2033_v55  ;;  %vm2337_vm5 = vmor (!%p247_p3), %vm648_vm3, %vm649_vm4  ;;  %vm1654_vm11 = vcmask (!%p247_p3), 123904  }
   0xa   : > { %vm2421_vm9 = vmor (!%p247_p3), %vm1088_vm7, %vm1089_vm8 }
   0xc   : > { %1937 = vmatpush3.bf16.msra.mxu0 (!%p247_p3), %v2033_v55  ;;  %v2286_v55 = vld [vmem:[%s2599_s3 + $0x30] sm:$0xff] (!%p247_p3)  }
   0xe   : > { %s2610_s15 = smov (!%p313_p4, %s2054_s15), 1 }
   0xf   : > { %s2113_s19 = smul.u32 80, %s2610_s15 }
  0x11   : > { %s2119_s22 = scalar_lea.vmem %s2596_s0, %s2113_s19  ;;  %s1907_s24 = sadd.s32 64, %s2113_s19 }
  0x12   : > { %v366_v0 = vld [vmem:[%s2119_s22 + $0x8] sm:$0xf]  ;;  %v367_v1 = vld [vmem:[%s2119_s22 + $0xc] sm:$0x1]  ;;  %v364_v2 = vld [vmem:[%s2119_s22] sm:$0xf]  ;;  %s2168_s28 = scalar_lea.vmem %s2597_s1, %s1907_s24 }
  0x13   : > { %v2124_v3 = vcombine.low %v366_v0, %v367_v1  ;;  %v365_v4 = vld [vmem:[%s2119_s22 + $0x4] sm:$0x1]  ;;  %v370_v5 = vld [vmem:[%s2119_s22 + $0x18] sm:$0xf]  ;;  %v371_v6 = vld [vmem:[%s2119_s22 + $0x1c] sm:$0x1]  ;;  %v1795_v7 = vcombine.low %v366_v0, %v366_v0  ;;  %v1804_v9 = vcombine.low %v364_v2, %v364_v2 }
  0x14   : > { %v2129_v8 = vcombine.low %v364_v2, %v365_v4  ;;  %v368_v10 = vld [vmem:[%s2119_s22 + $0x10] sm:$0xf]  ;;  %v369_v11 = vld [vmem:[%s2119_s22 + $0x14] sm:$0x1]  ;;  %v1797_v12 = vcombine.low %v370_v5, %v370_v5  ;;  %v2134_v13 = vld [vmem:[%s2119_s22 + $0x20] sm:$0xf]  ;;  %v2138_v14 = vcombine.low %v370_v5, %v371_v6 }
  0x15   : > { %511 = vrot.lane.b32.xlu1 %v2124_v3, %s2064_s23  ;;  %v2140_v15 = vcombine.low %v368_v10, %v369_v11  ;;  %v433_v16 = vshrl.u32 %v1795_v7, 16  ;;  %v1798_v17 = vcombine.low %v2134_v13, %v2134_v13  ;;  %v436_v20 = vshll.u32 %v1795_v7, 16  ;;  %v2151_v33 = vld [vmem:[%s2119_s22 + $0x30] sm:$0xf]  ;;  %v2154_v34 = vld [vmem:[%s2119_s22 + $0x28] sm:$0xf] }
  0x16   : > { %509 = vrot.lane.b32.xlu0 %v2129_v8, %s2064_s23  ;;  %v447_v18 = vshrl.u32 %v1797_v12, 16  ;;  %v450_v19 = vshll.u32 %v1797_v12, 16  ;;  %v1796_v21 = vcombine.low %v368_v10, %v368_v10  ;;  %v527_v28 = vshrl.u32 %v1804_v9, 16  ;;  %v2174_v44 = vld [vmem:[%s2168_s28] sm:$0xf]  ;;  %s1909_s10 = sadd.s32 72, %s2113_s19 }
  0x17   : > { %v435_v22 = vrot.slane %v433_v16, 7  ;;  %v454_v23 = vshrl.u32 %v1798_v17, 16  ;;  %v457_v27 = vshll.u32 %v1798_v17, 16  ;;  %v1800_v36 = vcombine.low %v2151_v33, %v2151_v33  ;;  %v378_v45 = vld [vmem:[%s2119_s22 + $0x38] sm:$0xf]  ;;  %s352_s20 = scalar_lea.vmem %s2598_s2, %s1909_s10 }
  0x18   : > { %v449_v24 = vrot.slane %v447_v18, 7  ;;  %v440_v25 = vshrl.u32 %v1796_v21, 16  ;;  %v443_v32 = vshll.u32 %v1796_v21, 16  ;;  %v529_v38 = vrot.slane %v527_v28, 7  ;;  %v373_v60 = vld [vmem:[%s2119_s22 + $0x24] sm:$0x1] }
  0x19   : > { %515 = vrot.lane.b32.xlu1 %v2138_v14, %s2064_s23  ;;  %v456_v26 = vrot.slane %v454_v23, 7  ;;  %v438_v30 = vor.u32 %v436_v20, %v435_v22  ;;  %v530_v39 = vshll.u32 %v1804_v9, 16  ;;  %v1799_v40 = vcombine.low %v2154_v34, %v2154_v34  ;;  %v375_v12 = vld [vmem:[%s2119_s22 + $0x2c] sm:$0x1]  ;;  %v379_v23 = vld [vmem:[%s2119_s22 + $0x3c] sm:$0x1] }
  0x1a   : > { %513 = vrot.lane.b32.xlu0 %v2140_v15, %s2064_s23  ;;  %v452_v29 = vor.u32 %v450_v19, %v449_v24  ;;  %v442_v31 = vrot.slane %v440_v25, 7  ;;  %v468_v41 = vshrl.u32 %v1800_v36, 16  ;;  %v471_v48 = vshll.u32 %v1800_v36, 16  ;;  %v377_v25 = vld [vmem:[%s2119_s22 + $0x34] sm:$0x1] }
  0x1b   : > { %v2158_v35 = vor.u32 %v457_v27, %v456_v26  ;;  %v532_v42 = vor.u32 %v530_v39, %v529_v38  ;;  %v461_v43 = vshrl.u32 %v1799_v40, 16  ;;  %v927_v49 = vshrl.u32 %v2140_v15, 16 }
  0x1c   : > { %v445_v37 = vor.u32 %v443_v32, %v442_v31  ;;  %v470_v47 = vrot.slane %v468_v41, 7  ;;  %v1802_v50 = vcombine.low %v2174_v44, %v2174_v44  ;;  %v464_v52 = vshll.u32 %v1799_v40, 16  ;;  %v381_v31 = vld [vmem:[%s2168_s28 + $0x4] sm:$0x1]  ;;  %s1786_s28 = sshll.u32 %s2610_s15, 1 }
  0x1d   : > { %492 = vrot.lane.b32.xlu1 %v452_v29, %s2065_s25  ;;  %v463_v51 = vrot.slane %v461_v43, 7  ;;  %v921_v53 = vshrl.u32 %v2124_v3, 16  ;;  %v1801_v54 = vcombine.low %v378_v45, %v378_v45  ;;  %v929_v57 = vrot.slane %v927_v49, 7  ;;  %v2273_v43 = vld [vmem:[%s2599_s3 + $0x20] sm:$0xff]  }
  0x1e   : > { %488 = vrot.lane.b32.xlu0 %v438_v30, %s2065_s25  ;;  %v2190_v56 = vor.u32 %v471_v48, %v470_v47  ;;  %v930_v58 = vshll.u32 %v2140_v15, 16  ;;  %v482_v59 = vshrl.u32 %v1802_v50, 16  ;;  %v924_v63 = vshll.u32 %v2124_v3, 16  ;;  %1958 = vmatprep.subr.bf16.mxu0 %v2273_v43 }
  0x1f   : > { %v466_v61 = vor.u32 %v464_v52, %v463_v51  ;;  %v923_v62 = vrot.slane %v921_v53, 7  ;;  %v475_v0 = vshrl.u32 %v1801_v54, 16  ;;  %v2197_v1 = vcombine.low %v2134_v13, %v373_v60  ;;  %v383_v53 = vld [vmem:[%s352_s20 + $0x4] sm:$0x1] }
  0x20   : > { %v2201_v2 = vor.u32 %v930_v58, %v929_v57  ;;  %v484_v4 = vrot.slane %v482_v59, 7  ;;  %v485_v5 = vshll.u32 %v1802_v50, 16  ;;  %v478_v9 = vshll.u32 %v1801_v54, 16  ;;  %v382_v50 = vld [vmem:[%s352_s20] sm:$0xf] }
  0x21   : > { %494 = vrot.lane.b32.xlu1 %v2158_v35, %s2065_s25  ;;  %v926_v6 = vor.u32 %v924_v63, %v923_v62  ;;  %v477_v7 = vrot.slane %v475_v0, 7  ;;  %v939_v11 = vshrl.u32 %v2197_v1, 16  ;;  %v933_v16 = vshrl.u32 %v2138_v14, 16 }
  0x22   : > { %490 = vrot.lane.b32.xlu0 %v445_v37, %s2065_s25  ;;  %v2206_v10 = vor.u32 %v485_v5, %v484_v4  ;;  %v2213_v17 = vcombine.low %v2154_v34, %v375_v12  ;;  %v942_v19 = vshll.u32 %v2197_v1, 16  ;;  %v936_v21 = vshll.u32 %v2138_v14, 16 }
  0x23   : > { %v480_v13 = vor.u32 %v478_v9, %v477_v7  ;;  %v941_v18 = vrot.slane %v939_v11, 7  ;;  %v935_v20 = vrot.slane %v933_v16, 7  ;;  %v2228_v26 = vcombine.low %v378_v45, %v379_v23 }
  0x24   : > { %v2233_v27 = vcombine.low %v2151_v33, %v377_v25  ;;  %v986_v28 = vshrl.u32 %v2129_v8, 16  ;;  %v2034_v33 = vld [vmem:[%s2599_s3 + $0x10] sm:$0xff]   ;;  %v2250_v34 = vcombine.low %v2174_v44, %v381_v31  ;;  %v945_v36 = vshrl.u32 %v2213_v17, 16 }
  0x25   : > { %535 = vrot.lane.b32.xlu1 %v438_v30, %s2066_s5  ;;  %v2222_v22 = vor.u32 %v942_v19, %v941_v18  ;;  %v938_v24 = vor.u32 %v936_v21, %v935_v20  ;;  %v989_v30 = vshll.u32 %v2129_v8, 16  ;;  %1946 = vmatprep.subr.bf16.mxu1 %v2034_v33  ;;  %v948_v40 = vshll.u32 %v2213_v17, 16 }
  0x26   : > { %533 = vrot.lane.b32.xlu0 %v532_v42, %s2066_s5  ;;  %v951_v8 = vshrl.u32 %v2233_v27, 16  ;;  %1947 = vmatpush3.bf16.msra.mxu1 %v2034_v33  ;;  %v963_v38 = vshrl.u32 %v2250_v34, 16  ;;  %v947_v39 = vrot.slane %v945_v36, 7  ;;  %v957_v41 = vshrl.u32 %v2228_v26, 16  ;;  %v2035_v42 = vld [vmem:[%s2599_s3 + $0x18] sm:$0xff]  }
  0x27   : > { %1948 = vmatprep.subr.bf16.mxu1 %v2035_v42  ;;  %v966_v46 = vshll.u32 %v2250_v34, 16  ;;  %v960_v49 = vshll.u32 %v2228_v26, 16  ;;  %v1870_v54 = vcombine.low %v382_v50, %v382_v50 }
  0x28   : > { %v965_v45 = vrot.slane %v963_v38, 7  ;;  %v950_v47 = vor.u32 %v948_v40, %v947_v39  ;;  %v959_v48 = vrot.slane %v957_v41, 7 }
  0x29   : > { %539 = vrot.lane.b32.xlu1 %v452_v29, %s2066_s5  ;;  %v988_v29 = vrot.slane %v986_v28, 7  ;;  %v1288_v57 = vshrl.u32 %v1870_v54, 16  ;;  %v1291_v60 = vshll.u32 %v1870_v54, 16 }
  0x2a   : > { %537 = vrot.lane.b32.xlu0 %v445_v37, %s2066_s5  ;;  %v954_v37 = vshll.u32 %v2233_v27, 16  ;;  %1949 = vmatpush3.bf16.msra.mxu1 %v2035_v42  ;;  %v968_v51 = vor.u32 %v966_v46, %v965_v45  ;;  %v962_v52 = vor.u32 %v960_v49, %v959_v48 }
  0x2b   : > { %v991_v32 = vor.u32 %v989_v30, %v988_v29  ;;  %1970 = vmatprep.subr.bf16.mxu1 %v2286_v55  ;;  %v1290_v59 = vrot.slane %v1288_v57, 7 }
  0x2d   : > { %498 = vrot.lane.b32.xlu1 %v2190_v56, %s2065_s25  ;;  %v1293_v63 = vor.u32 %v1291_v60, %v1290_v59 }
  0x2e   : > { %496 = vrot.lane.b32.xlu0 %v466_v61, %s2065_s25 }
  0x31   : > { %971 = vrot.lane.b32.xlu1 %v2201_v2, %s2065_s25 }
  0x32   : > { %969 = vrot.lane.b32.xlu0 %v926_v6, %s2065_s25 }
  0x35   : > { %502 = vrot.lane.b32.xlu1 %v2206_v10, %s2065_s25 }
  0x36   : > { %500 = vrot.lane.b32.xlu0 %v480_v13, %s2065_s25 }
  0x39   : > { %519 = vrot.lane.b32.xlu1 %v2213_v17, %s2064_s23 }
  0x3a   : > { %517 = vrot.lane.b32.xlu0 %v2197_v1, %s2064_s23 }
  0x3d   : > { %975 = vrot.lane.b32.xlu1 %v2222_v22, %s2065_s25 }
  0x3e   : > { %973 = vrot.lane.b32.xlu0 %v938_v24, %s2065_s25 }
  0x41   : > { %523 = vrot.lane.b32.xlu1 %v2228_v26, %s2064_s23 }
  0x42   : > { %521 = vrot.lane.b32.xlu0 %v2233_v27, %s2064_s23 }
  0x45   : > { %543 = vrot.lane.b32.xlu1 %v466_v61, %s2066_s5 }
  0x46   : > { %541 = vrot.lane.b32.xlu0 %v2158_v35, %s2066_s5  ;;  %v953_v35 = vrot.slane %v951_v8, 7 }
  0x48   : > { %v956_v44 = vor.u32 %v954_v37, %v953_v35 }
  0x49   : > { %994 = vrot.lane.b32.xlu1 %v926_v6, %s2066_s5 }
  0x4a   : > { %992 = vrot.lane.b32.xlu0 %v991_v32, %s2066_s5 }
  0x4d   : > { %547 = vrot.lane.b32.xlu1 %v480_v13, %s2066_s5 }
  0x4e   : > { %545 = vrot.lane.b32.xlu0 %v2190_v56, %s2066_s5  ;;  %v2289_v56 = vcombine.low %v382_v50, %v383_v53 }
  0x50   : > { %v1477_v58 = vshrl.u32 %v2289_v56, 16  ;;  %v1480_v62 = vshll.u32 %v2289_v56, 16 }
  0x51   : > { %998 = vrot.lane.b32.xlu1 %v938_v24, %s2066_s5 }
  0x52   : > { %996 = vrot.lane.b32.xlu0 %v2201_v2, %s2066_s5  ;;  %v1479_v61 = vrot.slane %v1477_v58, 7 }
  0x54   : > { %v1482_v0 = vor.u32 %v1480_v62, %v1479_v61 }
  0x55   : > { %979 = vrot.lane.b32.xlu1 %v956_v44, %s2065_s25 }
  0x56   : > { %977 = vrot.lane.b32.xlu0 %v950_v47, %s2065_s25 }
  0x59   : > { %983 = vrot.lane.b32.xlu1 %v968_v51, %s2065_s25 }
  0x5a   : > { %981 = vrot.lane.b32.xlu0 %v962_v52, %s2065_s25 }
  0x5d   : > { %1002 = vrot.lane.b32.xlu1 %v950_v47, %s2066_s5 }
  0x5e   : > { %1000 = vrot.lane.b32.xlu0 %v2222_v22, %s2066_s5 }
  0x61   : > { %1006 = vrot.lane.b32.xlu1 %v962_v52, %s2066_s5 }
  0x62   : > { %1004 = vrot.lane.b32.xlu0 %v956_v44, %s2066_s5 }
  0x65   : > { %1296 = vrot.lane.b32.xlu1 %v2250_v34, %s2064_s23 }
  0x66   : > { %1294 = vrot.lane.b32.xlu0 %v1293_v63, %s2065_s25 }
  0x69   : > { %1483 = vrot.lane.b32.xlu1 %v1482_v0, %s2065_s25 }
  0x6a   : > { %1298 = vrot.lane.b32.xlu0 %v2206_v10, %s2066_s5 }
  0x6e   : > { %1485 = vrot.lane.b32.xlu0 %v968_v51, %s2066_s5  ;;  %s362_s5 = scalar_lea.vmem %s2600_s4, %s1786_s28 }
  0x87   : > { %v2307_v2 = vpop.permute.xlu1 %511 }
  0x88   : > { %v2309_v4 = vpop.permute.xlu0 %509 }
  0x8b   : > { %v2311_v5 = vpop.permute.xlu1 %515 }
  0x8c   : > { %v2313_v6 = vpop.permute.xlu0 %513 }
  0x8f   : > { %v493_v7 = vpop.permute.xlu1 %492 }
  0x90   : > { %v489_v9 = vpop.permute.xlu0 %488  ;;  %v558_v23 = vsel %vm549_vm0, %v2138_v14, %v493_v7 }
  0x91   : > { %v552_v13 = vsel %vm549_vm0, %v2124_v3, %v489_v9  ;;  %v580_v38 = vsel %vm574_vm1, %v558_v23, %v2313_v6 }
  0x92   : > { %v576_v21 = vsel %vm574_vm1, %v552_v13, %v2309_v4 }
  0x93   : > { %v495_v11 = vpop.permute.xlu1 %494 }
  0x94   : > { %v491_v12 = vpop.permute.xlu0 %490  ;;  %v561_v19 = vsel %vm549_vm0, %v2197_v1, %v495_v11 }
  0x95   : > { %v555_v10 = vsel %vm549_vm0, %v2140_v15, %v491_v12  ;;  %v582_v33 = vsel %vm574_vm1, %v561_v19, %v2311_v5 }
  0x96   : > { %v578_v18 = vsel %vm574_vm1, %v555_v10, %v2307_v2 }
  0x97   : > { %v536_v16 = vpop.permute.xlu1 %535 }
  0x98   : > { %v595_v20 = vsel %vm591_vm2, %v578_v18, %v536_v16  ;;  %v534_v22 = vpop.permute.xlu0 %533 }
  0x99   : > { %v1807_v24 = vcombine.low %v595_v20, %v595_v20  ;;  %v1808_v25 = vcombine.high %v595_v20, %v595_v20  ;;  %v593_v28 = vsel %vm591_vm2, %v576_v21, %v534_v22 }
  0x9a   : > { %v1805_v29 = vcombine.low %v593_v28, %v593_v28  ;;  %v1806_v30 = vcombine.high %v593_v28, %v593_v28 }
  0x9b   : > { %v666_v31 = vshrl.u32 %v1807_v24, 16  ;;  %v669_v32 = vshll.u32 %v1807_v24, 16  ;;  %v540_v8 = vpop.permute.xlu1 %539  ;;  %v675_v42 = vshll.u32 %v1808_v25, 16 }
  0x9c   : > { %v652_v36 = vshrl.u32 %v1805_v29, 16  ;;  %v655_v35 = vshll.u32 %v1805_v29, 16  ;;  %v599_v37 = vsel %vm591_vm2, %v582_v33, %v540_v8  ;;  %v538_v39 = vpop.permute.xlu0 %537  ;;  %v661_v47 = vshll.u32 %v1806_v30, 16 }
  0x9d   : > { %v668_v40 = vrot.slane %v666_v31, 4  ;;  %v671_v41 = vrot.slane %v669_v32, 5  ;;  %v1811_v44 = vcombine.low %v599_v37, %v599_v37  ;;  %v1812_v48 = vcombine.high %v599_v37, %v599_v37 }
  0x9e   : > { %v654_v45 = vrot.slane %v652_v36, 4  ;;  %v657_v46 = vrot.slane %v655_v35, 5  ;;  %v597_v52 = vsel %vm591_vm2, %v580_v38, %v538_v39  ;;  %v677_v62 = vrot.slane %v675_v42, 5  ;;  %v2037_v38 = vld [vmem:[%s2599_s3 + $0x28] sm:$0xff]  }
  0x9f   : > { %v672_v49 = vor.u32 %v671_v41, %v668_v40  ;;  %v694_v50 = vshrl.u32 %v1811_v44, 16  ;;  %v697_v51 = vshll.u32 %v1811_v44, 16  ;;  %v499_v53 = vpop.permute.xlu1 %498  ;;  %v1809_v57 = vcombine.low %v597_v52, %v597_v52 }
  0xa0   : > { %v658_v54 = vor.u32 %v657_v46, %v654_v45  ;;  %v1810_v58 = vcombine.high %v597_v52, %v597_v52  ;;  %v497_v59 = vpop.permute.xlu0 %496  ;;  %v703_v63 = vshll.u32 %v1812_v48, 16  ;;  %v663_v11 = vrot.slane %v661_v47, 5 }
  0xa1   : > { %v696_v60 = vrot.slane %v694_v50, 4  ;;  %v699_v61 = vrot.slane %v697_v51, 5  ;;  %v680_v0 = vshrl.u32 %v1809_v57, 16  ;;  %v683_v7 = vshll.u32 %v1809_v57, 16 }
  0xa2   : > { %v659_v10 = vrot.slane %v658_v54, 4  ;;  %v673_v16 = vrot.slane %v672_v49, 4  ;;  %v689_v20 = vshll.u32 %v1810_v58, 16  ;;  %v705_v25 = vrot.slane %v703_v63, 5 }
  0xa3   : > { %v700_v12 = vor.u32 %v699_v61, %v696_v60  ;;  %v972_v13 = vpop.permute.xlu1 %971  ;;  %v682_v18 = vrot.slane %v680_v0, 4  ;;  %v685_v19 = vrot.slane %v683_v7, 5  ;;  %v567_v47 = vsel %vm549_vm0, %v2233_v27, %v499_v53 }
  0xa4   : > { %v970_v21 = vpop.permute.xlu0 %969  ;;  %v664_v23 = vsel %vm2337_vm5, %v659_v10, %v663_v11  ;;  %v2345_v24 = vsel %vm2337_vm5, %v673_v16, %v677_v62  ;;  %v691_v32 = vrot.slane %v689_v20, 5  ;;  %v1011_v44 = vsel %vm549_vm0, %v2140_v15, %v972_v13 }
  0xa5   : > { %v701_v22 = vrot.slane %v700_v12, 4  ;;  %v686_v28 = vor.u32 %v685_v19, %v682_v18  ;;  %v1821_v29 = vcombine.low %v664_v23, %v2345_v24  ;;  %v1009_v46 = vsel %vm549_vm0, %v2124_v3, %v970_v21 }
  0xa6   : > { %v1025_v50 = vsel %vm574_vm1, %v1011_v44, %v2307_v2  ;;  %v1024_v53 = vsel %vm574_vm1, %v1009_v46, %v2309_v4 }
  0xa7   : > { %v503_v30 = vpop.permute.xlu1 %502  ;;  %v687_v31 = vrot.slane %v686_v28, 4  ;;  %v2350_v33 = vsel %vm2337_vm5, %v701_v22, %v705_v25  ;;  %1938 = vmatprep.mubr.msk.bf16.mxu0 %vm791_vm6, %v1821_v29 }
  0xa8   : > { %v501_v8 = vpop.permute.xlu0 %500  ;;  %v573_v54 = vsel %vm549_vm0, %v2250_v34, %v503_v30 }
  0xa9   : > { %v2355_v36 = vsel %vm2337_vm5, %v687_v31, %v691_v32  ;;  %v570_v2 = vsel %vm549_vm0, %v2228_v26, %v501_v8 }
  0xaa   : > { %v1822_v35 = vcombine.low %v2355_v36, %v2350_v33 }
  0xab   : > { %v2359_v37 = vpop.permute.xlu1 %519 }
  0xac   : > { %v2364_v39 = vpop.permute.xlu0 %517  ;;  %1939 = vmatmul.mubr.msk.bf16.vlgmr.msra.gmra.mrb[0].mxu0 %vm791_vm6, %v1822_v35  ;;  %v586_v48 = vsel %vm574_vm1, %v567_v47, %v2359_v37 }
  0xad   : > { %1959 = vmatpush3.bf16.msra.mxu0 %v2273_v43  ;;  %v564_v43 = vsel %vm549_vm0, %v2213_v17, %v497_v59 }
  0xae   : > { %1960 = vmatprep.subr.bf16.mxu0 %v2037_v38  ;;  %v584_v15 = vsel %vm574_vm1, %v564_v43, %v2364_v39 }
  0xaf   : > { %v976_v40 = vpop.permute.xlu1 %975 }
  0xb0   : > { %v974_v41 = vpop.permute.xlu0 %973  ;;  %v1015_v51 = vsel %vm549_vm0, %v2197_v1, %v976_v40 }
  0xb1   : > { %1961 = vmatpush3.bf16.msra.mxu0 %v2037_v38  ;;  %v1013_v60 = vsel %vm549_vm0, %v2138_v14, %v974_v41  ;;  %v1027_v4 = vsel %vm574_vm1, %v1015_v51, %v2311_v5 }
  0xb2   : > { %v1026_v20 = vsel %vm574_vm1, %v1013_v60, %v2313_v6 }
  0xb3   : > { %v2368_v42 = vpop.permute.xlu1 %523 }
  0xb4   : > { %v2372_v45 = vpop.permute.xlu0 %521  ;;  %v590_v21 = vsel %vm574_vm1, %v573_v54, %v2368_v42 }
  0xb5   : > { %v588_v25 = vsel %vm574_vm1, %v570_v2, %v2372_v45 }
  0xb7   : > { %v544_v49 = vpop.permute.xlu1 %543 }
  0xb8   : > { %v603_v3 = vsel %vm591_vm2, %v586_v48, %v544_v49  ;;  %v542_v52 = vpop.permute.xlu0 %541 }
  0xb9   : > { %v1815_v57 = vcombine.low %v603_v3, %v603_v3  ;;  %v1816_v58 = vcombine.high %v603_v3, %v603_v3  ;;  %v601_v59 = vsel %vm591_vm2, %v584_v15, %v542_v52 }
  0xba   : > { %v1813_v1 = vcombine.low %v601_v59, %v601_v59  ;;  %v1814_v61 = vcombine.high %v601_v59, %v601_v59 }
  0xbb   : > { %v722_v62 = vshrl.u32 %v1815_v57, 16  ;;  %v725_v63 = vshll.u32 %v1815_v57, 16  ;;  %v731_v0 = vshll.u32 %v1816_v58, 16  ;;  %v995_v7 = vpop.permute.xlu1 %994 }
  0xbc   : > { %v708_v11 = vshrl.u32 %v1813_v1, 16  ;;  %v711_v12 = vshll.u32 %v1813_v1, 16  ;;  %v717_v13 = vshll.u32 %v1814_v61, 16  ;;  %v1035_v10 = vsel %vm591_vm2, %v1025_v50, %v995_v7  ;;  %v993_v16 = vpop.permute.xlu0 %992 }
  0xbd   : > { %v724_v18 = vrot.slane %v722_v62, 4  ;;  %v727_v19 = vrot.slane %v725_v63, 5  ;;  %v1833_v14 = vcombine.low %v1035_v10, %v1035_v10  ;;  %v1834_v5 = vcombine.high %v1035_v10, %v1035_v10 }
  0xbe   : > { %v710_v22 = vrot.slane %v708_v11, 4  ;;  %v713_v23 = vrot.slane %v711_v12, 5  ;;  %v733_v29 = vrot.slane %v731_v0, 5  ;;  %v1033_v30 = vsel %vm591_vm2, %v1024_v53, %v993_v16 }
  0xbf   : > { %v728_v28 = vor.u32 %v727_v19, %v724_v18  ;;  %v548_v31 = vpop.permute.xlu1 %547  ;;  %v719_v8 = vrot.slane %v717_v13, 5  ;;  %v1831_v35 = vcombine.low %v1033_v30, %v1033_v30  ;;  %v1832_v38 = vcombine.high %v1033_v30, %v1033_v30 }
  0xc0   : > { %v714_v32 = vor.u32 %v713_v23, %v710_v22  ;;  %v546_v40 = vpop.permute.xlu0 %545  ;;  %v1848_v41 = vrot.slane %v1833_v14, 9  ;;  %v607_v44 = vsel %vm591_vm2, %v590_v21, %v548_v31  ;;  %v1097_v43 = vrot.slane %v1834_v5, 5 }
  0xc1   : > { %v729_v6 = vrot.slane %v728_v28, 4  ;;  %v605_v46 = vsel %vm591_vm2, %v588_v25, %v546_v40  ;;  %v1847_v48 = vrot.slane %v1831_v35, 9  ;;  %v1819_v49 = vcombine.low %v607_v44, %v607_v44 }
  0xc2   : > { %v715_v47 = vrot.slane %v714_v32, 4  ;;  %v1093_v50 = vrot.slane %v1832_v38, 5  ;;  %v1820_v15 = vcombine.high %v607_v44, %v607_v44  ;;  %v1817_v51 = vcombine.low %v605_v46, %v605_v46 }
  0xc3   : > { %v1818_v3 = vcombine.high %v605_v46, %v605_v46  ;;  %v999_v52 = vpop.permute.xlu1 %998  ;;  %v2412_v53 = vsel %vm2337_vm5, %v729_v6, %v733_v29  ;;  %v750_v54 = vshrl.u32 %v1819_v49, 16  ;;  %v753_v57 = vshll.u32 %v1819_v49, 16 }
  0xc4   : > { %v1039_v58 = vsel %vm591_vm2, %v1027_v4, %v999_v52  ;;  %v997_v59 = vpop.permute.xlu0 %996  ;;  %v2417_v2 = vsel %vm2337_vm5, %v715_v47, %v719_v8  ;;  %v759_v60 = vshll.u32 %v1820_v15, 16  ;;  %v736_v1 = vshrl.u32 %v1817_v51, 16 }
  0xc5   : > { %v739_v61 = vshll.u32 %v1817_v51, 16  ;;  %v752_v62 = vrot.slane %v750_v54, 4  ;;  %v755_v63 = vrot.slane %v753_v57, 5  ;;  %v745_v0 = vshll.u32 %v1818_v3, 16 }
  0xc6   : > { %v1837_v7 = vcombine.low %v1039_v58, %v1039_v58  ;;  %v761_v11 = vrot.slane %v759_v60, 5  ;;  %v738_v12 = vrot.slane %v736_v1, 4  ;;  %v1838_v10 = vcombine.high %v1039_v58, %v1039_v58 }
  0xc7   : > { %v741_v13 = vrot.slane %v739_v61, 5  ;;  %v980_v16 = vpop.permute.xlu1 %979  ;;  %v756_v18 = vor.u32 %v755_v63, %v752_v62  ;;  %v747_v19 = vrot.slane %v745_v0, 5  ;;  %v1037_v21 = vsel %vm591_vm2, %v1026_v20, %v997_v59 }
  0xc8   : > { %v1850_v14 = vrot.slane %v1837_v7, 9  ;;  %v978_v22 = vpop.permute.xlu0 %977  ;;  %v1105_v5 = vrot.slane %v1838_v10, 5  ;;  %v1835_v25 = vcombine.low %v1037_v21, %v1037_v21  ;;  %v1836_v28 = vcombine.high %v1037_v21, %v1037_v21 }
  0xc9   : > { %v742_v23 = vor.u32 %v741_v13, %v738_v12  ;;  %v757_v29 = vrot.slane %v756_v18, 4  ;;  %v1094_v30 = vsel %vm2421_vm9, %v1847_v48, %v1093_v50  ;;  %v2430_v31 = vsel %vm2421_vm9, %v1848_v41, %v1097_v43 }
  0xca   : > { %v1823_v32 = vcombine.low %v2417_v2, %v2412_v53  ;;  %v1849_v35 = vrot.slane %v1835_v25, 9  ;;  %v1101_v38 = vrot.slane %v1836_v28, 5  ;;  %v2436_v20 = vsel %vm2421_vm9, %v1850_v14, %v1105_v5 }
  0xcb   : > { %v743_v8 = vrot.slane %v742_v23, 4  ;;  %v984_v40 = vpop.permute.xlu1 %983  ;;  %v2440_v6 = vsel %vm2337_vm5, %v757_v29, %v761_v11  ;;  %v1859_v44 = vcombine.low %v1094_v30, %v2430_v31  ;;  %v1019_v41 = vsel %vm549_vm0, %v2233_v27, %v980_v16  ;;  %v2039_v27 = vld [vmem:[%s2599_s3 + $0x38] sm:$0xff]  }
  0xcc   : > { %1942 = vmatprep.mubr.msk.bf16.mxu0 %vm791_vm6, %v1823_v32  ;;  %v982_v46 = vpop.permute.xlu0 %981  ;;  %v2450_v43 = vsel %vm2421_vm9, %v1849_v35, %v1101_v38  ;;  %v1017_v48 = vsel %vm549_vm0, %v2213_v17, %v978_v22  ;;  %v1877_v15 = vcombine.low %v2345_v24, %v2355_v36  ;;  %v1023_v51 = vsel %vm549_vm0, %v2250_v34, %v984_v40 }
  0xcd   : > { %v748_v47 = vsel %vm2337_vm5, %v743_v8, %v747_v19  ;;  %v1860_v49 = vcombine.low %v2450_v43, %v2436_v20  ;;  %1950 = vmatprep.mubr.msk.bf16.mxu1 %vm791_vm6, %v1859_v44  ;;  %v1029_v17 = vsel %vm574_vm1, %v1019_v41, %v2359_v37  ;;  %v1021_v52 = vsel %vm549_vm0, %v2228_v26, %v982_v46 }
  0xce   : > { %v1824_v50 = vcombine.low %v748_v47, %v2440_v6  ;;  %v1028_v57 = vsel %vm574_vm1, %v1017_v48, %v2364_v39  ;;  %v1031_v1 = vsel %vm574_vm1, %v1023_v51, %v2368_v42  ;;  %v1030_v0 = vsel %vm574_vm1, %v1021_v52, %v2372_v45 }
  0xcf   : > { %v1003_v3 = vpop.permute.xlu1 %1002  ;;  %1951 = vmatmul.mubr.msk.bf16.vlgmr.msra.gmra.mrb[0].mxu1 %vm791_vm6, %v1860_v49  ;;  %v1878_v42 = vcombine.low %v2350_v33, %v2417_v2  ;;  %v1879_v21 = vcombine.low %v2412_v53, %v748_v47  ;;  %v1894_v30 = vcombine.low %v2430_v31, %v2450_v43 }
  0xd0   : > { %1943 = vmatmul.mubr.msk.bf16.gmra.mrb[4].mxu0 %vm791_vm6, %v1824_v50  ;;  %v1043_v54 = vsel %vm591_vm2, %v1029_v17, %v1003_v3  ;;  %v1001_v24 = vpop.permute.xlu0 %1000  ;;  %1971 = vmatpush3.bf16.msra.mxu1 %v2286_v55 }
  0xd1   : > { %v1841_v36 = vcombine.low %v1043_v54, %v1043_v54  ;;  %v1842_v58 = vcombine.high %v1043_v54, %v1043_v54  ;;  %1962 = vmatprep.mubr.msk.bf16.mxu0 %vm791_vm6, %v1877_v15  ;;  %v1041_v34 = vsel %vm591_vm2, %v1028_v57, %v1001_v24  ;;  %1972 = vmatprep.subr.bf16.mxu1 %v2039_v27 }
  0xd2   : > { %v1839_v37 = vcombine.low %v1041_v34, %v1041_v34  ;;  %v1840_v26 = vcombine.high %v1041_v34, %v1041_v34 }
  0xd3   : > { %v1852_v59 = vrot.slane %v1841_v36, 9  ;;  %v1113_v60 = vrot.slane %v1842_v58, 5  ;;  %v1007_v61 = vpop.permute.xlu1 %1006 }
  0xd4   : > { %v1851_v62 = vrot.slane %v1839_v37, 9  ;;  %v1109_v39 = vrot.slane %v1840_v26, 5  ;;  %v1047_v63 = vsel %vm591_vm2, %v1031_v1, %v1007_v61  ;;  %v1005_v7 = vpop.permute.xlu0 %1004  ;;  %1973 = vmatpush3.bf16.msra.mxu1 %v2039_v27 }
  0xd5   : > { %v1114_v55 = vsel %vm2421_vm9, %v1852_v59, %v1113_v60  ;;  %v1845_v11 = vcombine.low %v1047_v63, %v1047_v63  ;;  %v1846_v12 = vcombine.high %v1047_v63, %v1047_v63  ;;  %v1045_v13 = vsel %vm591_vm2, %v1030_v0, %v1005_v7 }
  0xd6   : > { %v1110_v10 = vsel %vm2421_vm9, %v1851_v62, %v1109_v39  ;;  %v1843_v16 = vcombine.low %v1045_v13, %v1045_v13  ;;  %v1844_v18 = vcombine.high %v1045_v13, %v1045_v13 }
  0xd7   : > { %v1854_v19 = vrot.slane %v1845_v11, 9  ;;  %v1121_v14 = vrot.slane %v1846_v12, 5  ;;  %v1297_v45 = vpop.permute.xlu1 %1296  ;;  %v1861_v22 = vcombine.low %v1110_v10, %v1114_v55 }
  0xd8   : > { %v1853_v23 = vrot.slane %v1843_v16, 9  ;;  %v1117_v5 = vrot.slane %v1844_v18, 5  ;;  %1963 = vmatmul.mubr.msk.bf16.vlgmr.msra.gmra.mrb[8].mxu0 %vm791_vm6, %v1878_v42  ;;  %v1295_v25 = vpop.permute.xlu0 %1294 }
  0xd9   : > { %v1122_v28 = vsel %vm2421_vm9, %v1854_v19, %v1121_v14  ;;  %1966 = vmatprep.mubr.msk.bf16.mxu0 %vm791_vm6, %v1879_v21  ;;  %v1302_v33 = vsel %vm549_vm0, %v2289_v56, %v1295_v25  ;;  %1954 = vmatprep.mubr.msk.bf16.mxu1 %vm791_vm6, %v1861_v22 }
  0xda   : > { %v1118_v2 = vsel %vm2421_vm9, %v1853_v23, %v1117_v5  ;;  %v1304_v32 = vsel %vm574_vm1, %v1302_v33, %v1297_v45 }
  0xdb   : > { %v1484_v53 = vpop.permute.xlu1 %1483  ;;  %v1862_v29 = vcombine.low %v1118_v2, %v1122_v28  ;;  %v1896_v3 = vcombine.low %v1114_v55, %v1118_v2 }
  0xdc   : > { %v1299_v8 = vpop.permute.xlu0 %1298  ;;  %v1488_v35 = vsel %vm549_vm0, %v2289_v56, %v1484_v53  ;;  %v1895_v56 = vcombine.low %v2436_v20, %v1110_v10 }
  0xdd   : > { %v1306_v38 = vsel %vm591_vm2, %v1304_v32, %v1299_v8  ;;  %1955 = vmatmul.mubr.msk.bf16.gmra.mrb[4].mxu1 %vm791_vm6, %v1862_v29  ;;  %v1489_v47 = vsel %vm574_vm1, %v1488_v35, %v1297_v45 }
  0xde   : > { %v1871_v40 = vcombine.low %v1306_v38, %v1306_v38  ;;  %v1872_v44 = vcombine.high %v1306_v38, %v1306_v38  ;;  %1974 = vmatprep.mubr.msk.bf16.mxu1 %vm791_vm6, %v1894_v30 }
  0xe0   : > { %v1313_v41 = vshrl.u32 %v1871_v40, 16  ;;  %v1316_v46 = vshll.u32 %v1871_v40, 16  ;;  %v1486_v48 = vpop.permute.xlu0 %1485  ;;  %v1322_v50 = vshll.u32 %v1872_v44, 16 }
  0xe1   : > { %v1491_v31 = vsel %vm591_vm2, %v1489_v47, %v1486_v48 }
  0xe2   : > { %v1315_v43 = vrot.slane %v1313_v41, 4  ;;  %v1318_v49 = vrot.slane %v1316_v46, 5  ;;  %v1887_v27 = vcombine.low %v1491_v31, %v1491_v31  ;;  %v1888_v15 = vcombine.high %v1491_v31, %v1491_v31 }
  0xe3   : > { %v1324_v57 = vrot.slane %v1322_v50, 5 }
  0xe4   : > { %v1319_v51 = vor.u32 %v1318_v49, %v1315_v43  ;;  %v1889_v17 = vrot.slane %v1887_v27, 9  ;;  %v1499_v52 = vrot.slane %v1888_v15, 5 }
  0xe5   : > { %1975 = vmatmul.mubr.msk.bf16.vlgmr.msra.gmra.mrb[8].mxu1 %vm791_vm6, %v1895_v56 }
  0xe6   : > { %v1320_v54 = vrot.slane %v1319_v51, 4  ;;  %1978 = vmatprep.mubr.msk.bf16.mxu1 %vm791_vm6, %v1896_v3  ;;  %v1500_v36 = vsel %vm2421_vm9, %v1889_v17, %v1499_v52 }
  0xe7   : > { %v1897_v20 = vcombine.low %v1122_v28, %v1500_v36 }
  0xe8   : > { %v1325_v24 = vsel %vm2337_vm5, %v1320_v54, %v1324_v57 }
  0xe9   : > { %v1880_v58 = vcombine.low %v2440_v6, %v1325_v24 }
  0xeb   : > { %1967 = vmatmul.mubr.msk.bf16.gmra.mrb[12].mxu0 %vm791_vm6, %v1880_v58 }
  0xed   : > { %1979 = vmatmul.mubr.msk.bf16.gmra.mrb[12].mxu1 %vm791_vm6, %v1897_v20 }
 0x17f   : > { %v1940_v34 = vpop.f32.mrb[0].mxu0 }
 0x180   : > { %v838_v37 = vpop.f32.mrb[1].mxu0  ;;  %v893_v1 = vmul.f32 %v1940_v34, %v1940_v34  ;;  %v872_v39 = vsel %vm574_vm1, %v1940_v34, 0.0 }
 0x181   : > { %v891_v26 = vmul.f32 %v838_v37, %v838_v37  ;;  %v1941_v59 = vpop.f32.mrb[2].mxu0  ;;  %v869_v61 = vsel %vm574_vm1, %v838_v37, 0.0 }
 0x182   : > { %v841_v60 = vpop.f32.mrb[3].mxu0  ;;  %v894_v63 = vmul.f32 %v1941_v59, %v1941_v59  ;;  %v902_v11 = vsel %vm574_vm1, %v893_v1, 0.0  ;;  %v874_v12 = vsel %vm574_vm1, %v1941_v59, 0.0 }
 0x183   : > { %v870_v9 = vsel %vm574_vm1, %v841_v60, 0.0  ;;  %v892_v62 = vmul.f32 %v841_v60, %v841_v60  ;;  %v899_v6 = vsel %vm574_vm1, %v891_v26, 0.0 }
 0x184   : > { %v871_v4 = vadd.f32 %v870_v9, %v869_v61  ;;  %v904_v10 = vsel %vm574_vm1, %v894_v63, 0.0 }
 0x185   : > { %v900_v0 = vsel %vm574_vm1, %v892_v62, 0.0 }
 0x186   : > { %v873_v7 = vadd.f32 %v872_v39, %v871_v4  ;;  %v901_v55 = vadd.f32 %v900_v0, %v899_v6 }
 0x188   : > { %v903_v13 = vadd.f32 %v902_v11, %v901_v55  ;;  %v875_v42 = vadd.f32 %v874_v12, %v873_v7 }
 0x18a   : > { %v905_v16 = vadd.f32 %v904_v10, %v903_v13 }
 0x1a2   : > { %v1952_v18 = vpop.f32.mrb[0].mxu1 }
 0x1a3   : > { %v1944_v19 = vpop.f32.mrb[4].mxu0  ;;  %v1198_v14 = vpop.f32.mrb[1].mxu1  ;;  %v1253_v21 = vmul.f32 %v1952_v18, %v1952_v18  ;;  %v1232_v33 = vsel %vm574_vm1, %v1952_v18, 0.0 }
 0x1a4   : > { %v854_v45 = vpop.f32.mrb[5].mxu0  ;;  %v1251_v22 = vmul.f32 %v1198_v14, %v1198_v14  ;;  %v1953_v23 = vpop.f32.mrb[2].mxu1  ;;  %v880_v2 = vsel %vm574_vm1, %v1944_v19, 0.0  ;;  %v897_v53 = vmul.f32 %v1944_v19, %v1944_v19  ;;  %v1229_v32 = vsel %vm574_vm1, %v1198_v14, 0.0 }
 0x1a5   : > { %v876_v5 = vsel %vm574_vm1, %v854_v45, 0.0  ;;  %v895_v25 = vmul.f32 %v854_v45, %v854_v45  ;;  %v1945_v28 = vpop.f32.mrb[6].mxu0  ;;  %v1201_v29 = vpop.f32.mrb[3].mxu1  ;;  %v1254_v40 = vmul.f32 %v1953_v23, %v1953_v23  ;;  %v1262_v47 = vsel %vm574_vm1, %v1253_v21, 0.0 }
 0x1a6   : > { %v857_v30 = vpop.f32.mrb[7].mxu0  ;;  %v877_v8 = vadd.f32 %v876_v5, %v875_v42  ;;  %v1230_v38 = vsel %vm574_vm1, %v1201_v29, 0.0  ;;  %v1252_v46 = vmul.f32 %v1201_v29, %v1201_v29  ;;  %v1259_v48 = vsel %vm574_vm1, %v1251_v22, 0.0 }
 0x1a7   : > { %v906_v35 = vsel %vm574_vm1, %v895_v25, 0.0  ;;  %v1231_v41 = vadd.f32 %v1230_v38, %v1229_v32  ;;  %v878_v31 = vsel %vm574_vm1, %v857_v30, 0.0  ;;  %v896_v43 = vmul.f32 %v857_v30, %v857_v30 }
 0x1a8   : > { %v907_v44 = vadd.f32 %v906_v35, %v905_v16  ;;  %v1260_v50 = vsel %vm574_vm1, %v1252_v46, 0.0  ;;  %v898_v27 = vmul.f32 %v1945_v28, %v1945_v28  ;;  %v879_v56 = vadd.f32 %v878_v31, %v877_v8 }
 0x1a9   : > { %v1233_v49 = vadd.f32 %v1232_v33, %v1231_v41  ;;  %v910_v15 = vsel %vm574_vm1, %v897_v53, 0.0  ;;  %v1234_v51 = vsel %vm574_vm1, %v1953_v23, 0.0  ;;  %v1261_v17 = vadd.f32 %v1260_v50, %v1259_v48 }
 0x1aa   : > { %v908_v3 = vsel %vm574_vm1, %v896_v43, 0.0  ;;  %v1264_v54 = vsel %vm574_vm1, %v1254_v40, 0.0  ;;  %v882_v57 = vsel %vm574_vm1, %v1945_v28, 0.0  ;;  %v881_v24 = vadd.f32 %v880_v2, %v879_v56 }
 0x1ab   : > { %v1964_v52 = vpop.f32.mrb[8].mxu0  ;;  %v909_v36 = vadd.f32 %v908_v3, %v907_v44  ;;  %v1263_v20 = vadd.f32 %v1262_v47, %v1261_v17  ;;  %v1235_v59 = vadd.f32 %v1234_v51, %v1233_v49  ;;  %v912_v60 = vsel %vm574_vm1, %v898_v27, 0.0 }
 0x1ac   : > { %v1394_v58 = vpop.f32.mrb[9].mxu0  ;;  %v1449_v34 = vmul.f32 %v1964_v52, %v1964_v52  ;;  %v883_v1 = vadd.f32 %v882_v57, %v881_v24  ;;  %v1428_v9 = vsel %vm574_vm1, %v1964_v52, 0.0 }
 0x1ad   : > { %v1447_v37 = vmul.f32 %v1394_v58, %v1394_v58  ;;  %v1965_v26 = vpop.f32.mrb[10].mxu0  ;;  %v911_v61 = vadd.f32 %v910_v15, %v909_v36  ;;  %v1425_v4 = vsel %vm574_vm1, %v1394_v58, 0.0  ;;  %v1265_v12 = vadd.f32 %v1264_v54, %v1263_v20 }
 0x1ae   : > { %v1397_v62 = vpop.f32.mrb[11].mxu0  ;;  %v1450_v39 = vmul.f32 %v1965_v26, %v1965_v26  ;;  %v884_v0 = vrot.slane %v883_v1, 4  ;;  %v1458_v13 = vsel %vm574_vm1, %v1449_v34, 0.0  ;;  %v1430_v10 = vsel %vm574_vm1, %v1965_v26, 0.0 }
 0x1af   : > { %v1426_v6 = vsel %vm574_vm1, %v1397_v62, 0.0  ;;  %v1448_v63 = vmul.f32 %v1397_v62, %v1397_v62  ;;  %v913_v7 = vadd.f32 %v912_v60, %v911_v61  ;;  %v1455_v42 = vsel %vm574_vm1, %v1447_v37, 0.0 }
 0x1b0   : > { %v1427_v55 = vadd.f32 %v1426_v6, %v1425_v4  ;;  %v1956_v11 = vpop.f32.mrb[4].mxu1  ;;  %v885_v19 = vadd.f32 %v884_v0, %v883_v1  ;;  %v1460_v23 = vsel %vm574_vm1, %v1450_v39, 0.0 }
 0x1b1   : > { %v1456_v16 = vsel %vm574_vm1, %v1448_v63, 0.0  ;;  %v1214_v18 = vpop.f32.mrb[5].mxu1  ;;  %v914_v14 = vrot.slane %v913_v7, 4  ;;  %v1240_v5 = vsel %vm574_vm1, %v1956_v11, 0.0  ;;  %v1257_v32 = vmul.f32 %v1956_v11, %v1956_v11 }
 0x1b2   : > { %v1429_v45 = vadd.f32 %v1428_v9, %v1427_v55  ;;  %v1457_v21 = vadd.f32 %v1456_v16, %v1455_v42  ;;  %v1957_v22 = vpop.f32.mrb[6].mxu1  ;;  %v1236_v25 = vsel %vm574_vm1, %v1214_v18, 0.0  ;;  %v1255_v28 = vmul.f32 %v1214_v18, %v1214_v18 }
 0x1b3   : > { %v1217_v33 = vpop.f32.mrb[7].mxu1  ;;  %v886_v2 = vrot.slane %v885_v19, 2  ;;  %v915_v53 = vadd.f32 %v914_v14, %v913_v7  ;;  %v1237_v30 = vadd.f32 %v1236_v25, %v1235_v59  ;;  %v1258_v47 = vmul.f32 %v1957_v22, %v1957_v22 }
 0x1b4   : > { %v1459_v29 = vadd.f32 %v1458_v13, %v1457_v21  ;;  %v1266_v8 = vsel %vm574_vm1, %v1255_v28, 0.0  ;;  %v1238_v35 = vsel %vm574_vm1, %v1217_v33, 0.0  ;;  %v1256_v38 = vmul.f32 %v1217_v33, %v1217_v33 }
 0x1b5   : > { %v887_v40 = vadd.f32 %v886_v2, %v885_v19  ;;  %v916_v44 = vrot.slane %v915_v53, 2  ;;  %v1267_v41 = vadd.f32 %v1266_v8, %v1265_v12  ;;  %v1239_v46 = vadd.f32 %v1238_v35, %v1237_v30 }
 0x1b6   : > { %v1268_v48 = vsel %vm574_vm1, %v1256_v38, 0.0  ;;  %v1431_v31 = vadd.f32 %v1430_v10, %v1429_v45  ;;  %v1461_v43 = vadd.f32 %v1460_v23, %v1459_v29  ;;  %v1270_v15 = vsel %vm574_vm1, %v1257_v32, 0.0 }
 0x1b7   : > { %v1241_v49 = vadd.f32 %v1240_v5, %v1239_v46  ;;  %v1269_v50 = vadd.f32 %v1268_v48, %v1267_v41  ;;  %v917_v56 = vadd.f32 %v916_v44, %v915_v53  ;;  %v1242_v51 = vsel %vm574_vm1, %v1957_v22, 0.0 }
 0x1b8   : > { %v1976_v27 = vpop.f32.mrb[8].mxu1  ;;  %v888_v3 = vrot.slane %v887_v40, 1  ;;  %v1272_v24 = vsel %vm574_vm1, %v1258_v47, 0.0 }
 0x1b9   : > { %v1569_v17 = vpop.f32.mrb[9].mxu1  ;;  %v1243_v52 = vadd.f32 %v1242_v51, %v1241_v49  ;;  %v1271_v54 = vadd.f32 %v1270_v15, %v1269_v50  ;;  %v1624_v36 = vmul.f32 %v1976_v27, %v1976_v27  ;;  %v1603_v26 = vsel %vm574_vm1, %v1976_v27, 0.0 }
 0x1ba   : > { %v1977_v57 = vpop.f32.mrb[10].mxu1  ;;  %v1622_v58 = vmul.f32 %v1569_v17, %v1569_v17  ;;  %v918_v59 = vrot.slane %v917_v56, 1  ;;  %v1600_v60 = vsel %vm574_vm1, %v1569_v17, 0.0  ;;  %v889_v9 = vadd.f32 %v888_v3, %v887_v40 }
 0x1bb   : > { %v1572_v20 = vpop.f32.mrb[11].mxu1  ;;  %v1244_v34 = vrot.slane %v1243_v52, 4  ;;  %v1273_v37 = vadd.f32 %v1272_v24, %v1271_v54  ;;  %v1633_v63 = vsel %vm574_vm1, %v1624_v36, 0.0  ;;  %v1625_v7 = vmul.f32 %v1977_v57, %v1977_v57 }
 0x1bc   : > { %v1601_v1 = vsel %vm574_vm1, %v1572_v20, 0.0  ;;  %v1623_v61 = vmul.f32 %v1572_v20, %v1572_v20  ;;  %v1630_v0 = vsel %vm574_vm1, %v1622_v58, 0.0  ;;  %v919_v19 = vadd.f32 %v918_v59, %v917_v56 }
 0x1bd   : > { %v1245_v62 = vadd.f32 %v1244_v34, %v1243_v52  ;;  %v1274_v4 = vrot.slane %v1273_v37, 4  ;;  %v1602_v39 = vadd.f32 %v1601_v1, %v1600_v60  ;;  %v1605_v14 = vsel %vm574_vm1, %v1977_v57, 0.0 }
 0x1be   : > { %v1968_v6 = vpop.f32.mrb[12].mxu0  ;;  %v1631_v55 = vsel %vm574_vm1, %v1623_v61, 0.0  ;;  %v1635_v53 = vsel %vm574_vm1, %v1625_v7, 0.0 }
 0x1bf   : > { %v1410_v11 = vpop.f32.mrb[13].mxu0  ;;  %v1246_v12 = vrot.slane %v1245_v62, 2  ;;  %v1275_v13 = vadd.f32 %v1274_v4, %v1273_v37  ;;  %v1604_v42 = vadd.f32 %v1603_v26, %v1602_v39  ;;  %v1632_v10 = vadd.f32 %v1631_v55, %v1630_v0 }
 0x1c0   : > { %v1969_v16 = vpop.f32.mrb[14].mxu0  ;;  %v1980_v18 = vpop.f32.mrb[12].mxu1  ;;  %v1432_v45 = vsel %vm574_vm1, %v1410_v11, 0.0  ;;  %v1451_v21 = vmul.f32 %v1410_v11, %v1410_v11  ;;  %v1436_v29 = vsel %vm574_vm1, %v1968_v6, 0.0  ;;  %v1453_v30 = vmul.f32 %v1968_v6, %v1968_v6 }
 0x1c1   : > { %v1413_v22 = vpop.f32.mrb[15].mxu0  ;;  %v1585_v23 = vpop.f32.mrb[13].mxu1  ;;  %v1247_v5 = vadd.f32 %v1246_v12, %v1245_v62  ;;  %v1276_v25 = vrot.slane %v1275_v13, 2  ;;  %v1634_v28 = vadd.f32 %v1633_v63, %v1632_v10  ;;  %v1433_v33 = vadd.f32 %v1432_v45, %v1431_v31 }
 0x1c2   : > { %v1981_v2 = vpop.f32.mrb[14].mxu1  ;;  %v1462_v32 = vsel %vm574_vm1, %v1451_v21, 0.0  ;;  %v1434_v44 = vsel %vm574_vm1, %v1413_v22, 0.0  ;;  %v1438_v41 = vsel %vm574_vm1, %v1969_v16, 0.0  ;;  %v1454_v46 = vmul.f32 %v1969_v16, %v1969_v16 }
 0x1c3   : > { %v1588_v8 = vpop.f32.mrb[15].mxu1  ;;  %v1248_v35 = vrot.slane %v1247_v5, 1  ;;  %v1277_v38 = vadd.f32 %v1276_v25, %v1275_v13  ;;  %v1463_v40 = vadd.f32 %v1462_v32, %v1461_v43  ;;  %v1435_v47 = vadd.f32 %v1434_v44, %v1433_v33 }
 0x1c4   : > { %v1452_v48 = vmul.f32 %v1413_v22, %v1413_v22  ;;  %v1606_v50 = vadd.f32 %v1605_v14, %v1604_v42  ;;  %v1607_v27 = vsel %vm574_vm1, %v1585_v23, 0.0  ;;  %v1626_v51 = vmul.f32 %v1585_v23, %v1585_v23 }
 0x1c5   : > { %v1249_v31 = vadd.f32 %v1248_v35, %v1247_v5  ;;  %v1278_v49 = vrot.slane %v1277_v38, 1  ;;  %v1437_v56 = vadd.f32 %v1436_v29, %v1435_v47  ;;  %v1636_v17 = vadd.f32 %v1635_v53, %v1634_v28 }
 0x1c6   : > { %v1464_v15 = vsel %vm574_vm1, %v1452_v48, 0.0  ;;  %v1608_v54 = vadd.f32 %v1607_v27, %v1606_v50  ;;  %v1466_v57 = vsel %vm574_vm1, %v1453_v30, 0.0  ;;  %v1628_v24 = vmul.f32 %v1980_v18, %v1980_v18 }
 0x1c7   : > { %v1250_v3 = vadd.f32 %v1249_v31, %v889_v9  ;;  %v1279_v52 = vadd.f32 %v1278_v49, %v1277_v38  ;;  %v1465_v43 = vadd.f32 %v1464_v15, %v1463_v40  ;;  %v1439_v36 = vadd.f32 %v1438_v41, %v1437_v56 }
 0x1c8   : > { %v1637_v58 = vsel %vm574_vm1, %v1626_v51, 0.0  ;;  %v1609_v26 = vsel %vm574_vm1, %v1588_v8, 0.0  ;;  %v1468_v59 = vsel %vm574_vm1, %v1454_v46, 0.0  ;;  %v1627_v61 = vmul.f32 %v1588_v8, %v1588_v8 }
 0x1c9   : > { %v1280_v20 = vadd.f32 %v1279_v52, %v919_v19  ;;  %v1467_v34 = vadd.f32 %v1466_v57, %v1465_v43  ;;  %v1638_v37 = vadd.f32 %v1637_v58, %v1636_v17  ;;  %v1440_v60 = vrot.slane %v1439_v36, 4 }
 0x1ca   : > { %v1610_v1 = vadd.f32 %v1609_v26, %v1608_v54  ;;  %v1611_v9 = vsel %vm574_vm1, %v1980_v18, 0.0  ;;  %v1629_v39 = vmul.f32 %v1981_v2, %v1981_v2  ;;  %v1639_v63 = vsel %vm574_vm1, %v1627_v61, 0.0 }
 0x1cb   : > { %v1469_v62 = vadd.f32 %v1468_v59, %v1467_v34  ;;  %v1441_v4 = vadd.f32 %v1440_v60, %v1439_v36  ;;  %v1613_v7 = vsel %vm574_vm1, %v1981_v2, 0.0  ;;  %v1640_v55 = vadd.f32 %v1639_v63, %v1638_v37 }
 0x1cc   : > { %v1612_v6 = vadd.f32 %v1611_v9, %v1610_v1  ;;  %v1641_v11 = vsel %vm574_vm1, %v1628_v24, 0.0  ;;  %v1643_v19 = vsel %vm574_vm1, %v1629_v39, 0.0 }
 0x1cd   : > { %v1470_v0 = vrot.slane %v1469_v62, 4  ;;  %v1442_v12 = vrot.slane %v1441_v4, 2  ;;  %v1642_v10 = vadd.f32 %v1641_v11, %v1640_v55 }
 0x1ce   : > { %v1614_v13 = vadd.f32 %v1613_v7, %v1612_v6 }
 0x1cf   : > { %v1471_v42 = vadd.f32 %v1470_v0, %v1469_v62  ;;  %v1443_v16 = vadd.f32 %v1442_v12, %v1441_v4  ;;  %v1644_v45 = vadd.f32 %v1643_v19, %v1642_v10 }
 0x1d0   : > { %v1615_v18 = vrot.slane %v1614_v13, 4 }
 0x1d1   : > { %v1472_v14 = vrot.slane %v1471_v42, 2  ;;  %v1444_v21 = vrot.slane %v1443_v16, 1  ;;  %v1645_v5 = vrot.slane %v1644_v45, 4 }
 0x1d2   : > { %v1616_v22 = vadd.f32 %v1615_v18, %v1614_v13 }
 0x1d3   : > { %v1473_v23 = vadd.f32 %v1472_v14, %v1471_v42  ;;  %v1445_v25 = vadd.f32 %v1444_v21, %v1443_v16  ;;  %v1646_v2 = vadd.f32 %v1645_v5, %v1644_v45 }
 0x1d4   : > { %v1617_v28 = vrot.slane %v1616_v22, 2 }
 0x1d5   : > { %v1474_v33 = vrot.slane %v1473_v23, 1  ;;  %v1446_v53 = vadd.f32 %v1445_v25, %v1250_v3  ;;  %v1647_v32 = vrot.slane %v1646_v2, 2 }
 0x1d6   : > { %v1618_v29 = vadd.f32 %v1617_v28, %v1616_v22 }
 0x1d7   : > { %v1475_v30 = vadd.f32 %v1474_v33, %v1473_v23  ;;  %v1648_v38 = vadd.f32 %v1647_v32, %v1646_v2 }
 0x1d8   : > { %v1619_v8 = vrot.slane %v1618_v29, 1 }
 0x1d9   : > { %v1476_v35 = vadd.f32 %v1475_v30, %v1280_v20  ;;  %v1649_v44 = vrot.slane %v1648_v38, 1 }
 0x1da   : > { %v1620_v40 = vadd.f32 %v1619_v8, %v1618_v29 }
 0x1db   : > { %v1650_v46 = vadd.f32 %v1649_v44, %v1648_v38 }
 0x1dc   : > { %v1621_v41 = vadd.f32 %v1620_v40, %v1446_v53 }
 0x1dd   : > { %v1651_v47 = vadd.f32 %v1650_v46, %v1476_v35 }
 0x1df   : > { %v1653_v48 = vsel %vm1652_vm10, %v1621_v41, %v1651_v47 }
 0x1e0   : > { %1655 = vst.msk [vmem:[%s362_s5] sm:$0x3] %vm1654_vm11, %v1653_v48 }
 0x1e1 PF: > { %s14_s17 = sadd.s32 1, %s2062_s17   ;;  %s2605_s15 = smov %s2058_s16 }
 0x1e2   : > { %p11_p5 = scmp.ge.s32.totalorder %s14_s17, 4   ;;  %s2606_s16 = smov %s2608_s18 }
 0x1e4   :  { %13 = sbr.rel (!%p11_p5) target bundleno = 2 (0x2), region = 75 }

</bundles_post_ra>
